<compile_context>
chip_gen: v5e
topology: v5e:2x2
jax: 0.10.0
libtpu: 0.0.40
codegen_flags: <defaults>
</compile_context>

<pallas_src>
import functools

import jax
import jax.numpy as jnp
import numpy as np
from jax.experimental import pallas as pl
from jax.experimental.pallas import tpu as pltpu

EPS_WS = 1e-5   # weight-standardization eps (float32 path of the torch module)
EPS_GN = 1e-5   # nn.GroupNorm default eps


def _silu(v):
    return v * jax.nn.sigmoid(v)


# --------------------------------- kernel ----------------------------------- #
def resnet_block_kernel(*refs, has_res_conv):
    if has_res_conv:
        (x_ref, film_ref, w1_ref, w2_ref, vec_ref, oh_ref, oht_ref, resw_ref,
         o_ref, pad_ref) = refs
    else:
        (x_ref, film_ref, w1_ref, w2_ref, vec_ref, oh_ref, oht_ref,
         o_ref, pad_ref) = refs
        resw_ref = None

    bt, L, cin = x_ref.shape
    cout = o_ref.shape[-1]
    rows = bt * L
    OFF = 8                                           # sublane-aligned data offset

    onehot = oh_ref[...]                              # (Cout, G) f32
    onehot_t = oht_ref[...]                           # (G, Cout) f32
    G = onehot.shape[-1]
    inv_n = 1.0 / ((cout // G) * L)

    # packed per-channel vectors: one VMEM tile instead of 7 tiny inputs
    b1, g1w, g1b = vec_ref[0:1, :], vec_ref[1:2, :], vec_ref[2:3, :]
    b2, g2w, g2b = vec_ref[3:4, :], vec_ref[4:5, :], vec_ref[5:6, :]
    res_b = vec_ref[6:7, :]

    film = film_ref[0]                                # (Bt, 2*Cout) f32
    scale_p1 = film[:, :cout]                         # FiLM scale (+1 folded in wrapper)
    shift = film[:, cout:]

    # zero the conv halo rows (one row before / after every sample); the data
    # stores below never touch these rows, so each conv sees zero padding at
    # l = -1 and l = L without any masks or rolls.
    halo = jnp.zeros((bt, 1, pad_ref.shape[-1]), jnp.float32)
    pad_ref[:, OFF - 1:OFF, :] = halo
    pad_ref[:, OFF + L:OFF + L + 1, :] = halo

    def ws_conv3(h3, w_ref, bias, c):
        """k=3 / pad=1 conv as one im2col matmul.  h3: (Bt, L, c) f32."""
        pad_ref[:, OFF:OFF + L, :c] = h3
        prev3 = pad_ref[:, OFF - 1:OFF - 1 + L, :c]   # h[l-1] (zero at l == 0)
        nxt3 = pad_ref[:, OFF + 1:OFF + 1 + L, :c]    # h[l+1] (zero at l == L-1)
        taps = jnp.concatenate([prev3, h3, nxt3], axis=-1)            # (Bt, L, 3c)
        taps2 = taps.reshape(rows, 3 * c).astype(w_ref.dtype)         # one cast
        y = jnp.dot(taps2, w_ref[...], preferred_element_type=jnp.float32)
        return (y + bias).reshape(bt, L, cout)

    def gn_affine(h3, gamma, beta):
        """Single-pass GroupNorm folded with affine/FiLM into per-(sample, channel)
        scale/offset.  h3: (Bt, L, Cout) f32; gamma/beta broadcastable to (Bt, Cout)."""
        s_c = jnp.sum(h3, axis=1)                                      # (Bt, Cout)
        ss_c = jnp.sum(h3 * h3, axis=1)
        mean_g = jnp.dot(s_c, onehot, preferred_element_type=jnp.float32) * inv_n
        ex2_g = jnp.dot(ss_c, onehot, preferred_element_type=jnp.float32) * inv_n
        var_g = jnp.maximum(ex2_g - mean_g * mean_g, 0.0)              # f32 stats
        rstd_g = jax.lax.rsqrt(var_g + EPS_GN)
        mean_c = jnp.dot(mean_g, onehot_t, preferred_element_type=jnp.float32)
        rstd_c = jnp.dot(rstd_g, onehot_t, preferred_element_type=jnp.float32)
        alpha = rstd_c * gamma                                         # (Bt, Cout)
        return alpha, beta - mean_c * alpha

    x3 = x_ref[...]                                                    # (Bt, L, Cin) f32

    # ---- block1: WS-conv3 -> GroupNorm -> FiLM -> SiLU --------------------- #
    h3 = ws_conv3(x3, w1_ref, b1, cin)
    # GN affine and FiLM folded:  (hn*g + b)*(s+1) + sh == hn*(g*(s+1)) + (b*(s+1)+sh)
    alpha, beta = gn_affine(h3, g1w * scale_p1, g1b * scale_p1 + shift)
    h3 = h3 * alpha[:, None, :] + beta[:, None, :]
    h3 = h3 * jax.nn.sigmoid(h3)

    # ---- block2: WS-conv3 -> GroupNorm -> SiLU ------------------------------ #
    h3 = ws_conv3(h3, w2_ref, b2, cout)
    alpha, beta = gn_affine(h3, g2w, g2b)
    h3 = h3 * alpha[:, None, :] + beta[:, None, :]
    h3 = h3 * jax.nn.sigmoid(h3)

    # ---- residual ----------------------------------------------------------- #
    if has_res_conv:
        res = jnp.dot(x3.reshape(rows, cin).astype(resw_ref.dtype), resw_ref[...],
                      preferred_element_type=jnp.float32) + res_b
        res3 = res.reshape(bt, L, cout)
    else:
        res3 = x3                                      # dim == dim_out: identity
    o_ref[...] = (h3 + res3).astype(o_ref.dtype)


# --------------------------------- wrapper ---------------------------------- #
def resnet_block(x_blc, temb, p, *, groups, batch_tile=1,
                 matmul_dtype=jnp.float32, vmem_limit_bytes=None,
                 single_buffer_consts=True):
    """x_blc: (B, L, Cin) channels-last, temb: (B, T).  Returns (B, L, Cout) f32."""
    B, L, Cin = x_blc.shape
    Cout = p["b1"].shape[-1]
    G = groups
    Bt = batch_tile
    assert B % Bt == 0 and Cout % G == 0
    assert L % 8 == 0, "seq length must be a multiple of 8 (sublane tile)"
    has_res_conv = p.get("res_w") is not None
    if not has_res_conv:
        assert Cin == Cout, "identity residual requires dim == dim_out"

    # -------- grid-invariant prep, hoisted out of the kernel (runs once) ----- #
    def ws_im2col(w):               # standardize over the kernel-tap axis (axis 0)
        mean = jnp.mean(w, axis=0, keepdims=True)
        var = jnp.mean((w - mean) ** 2, axis=0, keepdims=True)         # biased
        wn = (w - mean) * jax.lax.rsqrt(var + EPS_WS)
        return wn.reshape(-1, w.shape[-1]).astype(matmul_dtype)        # (3*Cin_, Cout)

    w1n = ws_im2col(p["w1"])                          # (3*Cin,  Cout)
    w2n = ws_im2col(p["w2"])                          # (3*Cout, Cout)

    # time-embedding MLP for the whole batch once; fold the "+1" into FiLM scale
    t = jnp.dot(_silu(temb), p["mlp_w"],
                precision=jax.lax.Precision.HIGHEST) + p["mlp_b"]      # (B, 2*Cout)
    film = jnp.concatenate([t[:, :Cout] + 1.0, t[:, Cout:]], axis=-1)
    film = film.reshape(B // Bt, Bt, 2 * Cout).astype(jnp.float32)

    res_b = p["res_b"] if has_res_conv else jnp.zeros((1, Cout), jnp.float32)
    vecs = jnp.concatenate(
        [p["b1"], p["g1w"], p["g1b"], p["b2"], p["g2w"], p["g2b"],
         res_b, jnp.zeros((1, Cout), jnp.float32)], axis=0).astype(jnp.float32)

    cpg = Cout // G
    onehot = jnp.asarray(
        (np.arange(Cout)[:, None] // cpg) == np.arange(G)[None, :], jnp.float32)

    inputs = [x_blc.astype(jnp.float32), film, w1n, w2n, vecs, onehot, onehot.T]
    if has_res_conv:
        inputs.append(p["res_w"].astype(matmul_dtype))

    def call(single_buffer):
        def const_spec(shape):
            nd = len(shape)
            if single_buffer:
                return pl.BlockSpec(shape, lambda b: (0,) * nd,
                                    pipeline_mode=pl.Buffered(1))
            return pl.BlockSpec(shape, lambda b: (0,) * nd)

        in_specs = [
            pl.BlockSpec((Bt, L, Cin), lambda b: (b, 0, 0)),           # per-step x
            pl.BlockSpec((1, Bt, 2 * Cout), lambda b: (b, 0, 0)),      # per-step FiLM
            const_spec((3 * Cin, Cout)),                               # conv1 weights
            const_spec((3 * Cout, Cout)),                              # conv2 weights
            const_spec((8, Cout)),                                     # packed vectors
            const_spec((Cout, G)),                                     # channel->group
            const_spec((G, Cout)),                                     # group->channel
        ]
        if has_res_conv:
            in_specs.append(const_spec((Cin, Cout)))                   # residual 1x1

        cp = dict(dimension_semantics=("parallel",))
        if vmem_limit_bytes is not None:
            cp["vmem_limit_bytes"] = vmem_limit_bytes

        kernel = functools.partial(resnet_block_kernel, has_res_conv=has_res_conv)
        return pl.pallas_call(
            kernel,
            out_shape=jax.ShapeDtypeStruct((B, L, Cout), jnp.float32),
            grid=(B // Bt,),
            in_specs=in_specs,
            out_specs=pl.BlockSpec((Bt, L, Cout), lambda b: (b, 0, 0)),
            scratch_shapes=[pltpu.VMEM((Bt, L + 16, max(Cin, Cout)), jnp.float32)],
            compiler_params=pltpu.CompilerParams(**cp),
        )(*inputs)

    if single_buffer_consts:
        try:
            return call(True)
        except Exception:
            # compatibility fallback: this JAX build rejects pipeline_mode=Buffered(1)
            return call(False)
    return call(False)


# ------------------ pure-JAX reference (NCW, mimics PyTorch) ----------------- #
def reference_forward(x_ncw, temb, p, groups):
    HI = jax.lax.Precision.HIGHEST

    def ws_conv(x, w_kic, bias):
        w = jnp.transpose(w_kic, (2, 1, 0))                            # (Cout, Cin, 3)
        mean = jnp.mean(w, axis=-1, keepdims=True)
        var = jnp.mean((w - mean) ** 2, axis=-1, keepdims=True)
        wn = (w - mean) * jax.lax.rsqrt(var + EPS_WS)
        y = jax.lax.conv_general_dilated(
            x, wn, window_strides=(1,), padding=((1, 1),),
            dimension_numbers=("NCH", "OIH", "NCH"), precision=HI)
        return y + bias[None, :, None]

    def group_norm(x, gamma, beta):
        B, C, L = x.shape
        xg = x.reshape(B, groups, C // groups, L)
        mean = xg.mean(axis=(2, 3), keepdims=True)
        var = ((xg - mean) ** 2).mean(axis=(2, 3), keepdims=True)
        xn = ((xg - mean) * jax.lax.rsqrt(var + EPS_GN)).reshape(B, C, L)
        return xn * gamma[None, :, None] + beta[None, :, None]

    silu = lambda v: v * jax.nn.sigmoid(v)
    Cout = p["b1"].shape[-1]

    t = jnp.dot(silu(temb), p["mlp_w"], precision=HI) + p["mlp_b"][0]
    scale = t[:, :Cout][:, :, None]
    shift = t[:, Cout:][:, :, None]

    h = ws_conv(x_ncw, p["w1"], p["b1"][0])
    h = group_norm(h, p["g1w"][0], p["g1b"][0])
    h = h * (scale + 1.0) + shift
    h = silu(h)

    h = ws_conv(h, p["w2"], p["b2"][0])
    h = group_norm(h, p["g2w"][0], p["g2b"][0])
    h = silu(h)

    if p.get("res_w") is None:
        res = x_ncw
    else:
        res = jnp.einsum("bcl,cd->bdl", x_ncw, p["res_w"],
                         precision=HI) + p["res_b"][0][None, :, None]
    return h + res


def make_params(key, dim, dim_out, t_dim, *, with_res_conv=True):
    ks = jax.random.split(key, 12)
    n = jax.random.normal
    return {
        "w1":    0.2 * n(ks[0], (3, dim, dim_out), jnp.float32),
        "b1":    0.1 * n(ks[1], (1, dim_out), jnp.float32),
        "g1w":   1.0 + 0.1 * n(ks[2], (1, dim_out), jnp.float32),
        "g1b":   0.1 * n(ks[3], (1, dim_out), jnp.float32),
        "w2":    0.2 * n(ks[4], (3, dim_out, dim_out), jnp.float32),
        "b2":    0.1 * n(ks[5], (1, dim_out), jnp.float32),
        "g2w":   1.0 + 0.1 * n(ks[6], (1, dim_out), jnp.float32),
        "g2b":   0.1 * n(ks[7], (1, dim_out), jnp.float32),
        "mlp_w": 0.2 * n(ks[8], (t_dim, 2 * dim_out), jnp.float32),
        "mlp_b": 0.1 * n(ks[9], (1, 2 * dim_out), jnp.float32),
        "res_w": 0.2 * n(ks[10], (dim, dim_out), jnp.float32) if with_res_conv else None,
        "res_b": 0.1 * n(ks[11], (1, dim_out), jnp.float32) if with_res_conv else None,
    }


if __name__ == "__main__":
    key = jax.random.PRNGKey(0)
    B, L, dim, dim_out, T, groups = 2, 16, 4, 8, 32, 8
    kp, kx, kt, kp2, kx2 = jax.random.split(key, 5)

    p = make_params(kp, dim, dim_out, T)
    x_ncw = jax.random.normal(kx, (B, dim, L), jnp.float32)        # PyTorch NCW input
    temb = jax.random.normal(kt, (B, T), jnp.float32)
    x_blc = jnp.transpose(x_ncw, (0, 2, 1))                        # channels-last
    ref = jnp.transpose(reference_forward(x_ncw, temb, p, groups), (0, 2, 1))

    # f32 tolerance accommodates the MXU's f32-via-bf16-pass matmul decomposition.
    TOL32 = dict(rtol=2e-2, atol=2e-2)

    # f32, one sample per grid step (>=2 parallel steps -> both v7x TCs busy)
    out = jax.block_until_ready(
        resnet_block(x_blc, temb, p, groups=groups, batch_tile=1))
    np.testing.assert_allclose(np.asarray(out), np.asarray(ref), **TOL32)

    # f32, both samples in one fatter grid step
    out2 = jax.block_until_ready(
        resnet_block(x_blc, temb, p, groups=groups, batch_tile=2))
    np.testing.assert_allclose(np.asarray(out2), np.asarray(ref), **TOL32)

    # bf16 MXU-operand path (recommended default on v6e/v7x); stats/FiLM stay f32
    outb = jax.block_until_ready(
        resnet_block(x_blc, temb, p, groups=groups, batch_tile=2,
                     matmul_dtype=jnp.bfloat16))
    np.testing.assert_allclose(np.asarray(outb), np.asarray(ref), rtol=5e-2, atol=1e-1)

    # identity-residual path (dim == dim_out -> the 1x1 residual matmul is skipped)
    p_id = make_params(kp2, dim_out, dim_out, T, with_res_conv=False)
    x2_ncw = jax.random.normal(kx2, (B, dim_out, L), jnp.float32)
    ref_id = jnp.transpose(reference_forward(x2_ncw, temb, p_id, groups), (0, 2, 1))
    out_id = jax.block_until_ready(
        resnet_block(jnp.transpose(x2_ncw, (0, 2, 1)), temb, p_id,
                     groups=groups, batch_tile=1))
    np.testing.assert_allclose(np.asarray(out_id), np.asarray(ref_id), **TOL32)

    print("KERNEL_OK")
</pallas_src>

<mosaic_0001>
module attributes {stable_mosaic.version = 11 : i64} {
  func.func @resnet_block_kernel(%arg0: i32, %arg1: memref<1x16x4xf32, #tpu.memory_space<vmem>>, %arg2: memref<1x1x16xf32, #tpu.memory_space<vmem>>, %arg3: memref<12x8xf32, #tpu.memory_space<vmem>>, %arg4: memref<24x8xf32, #tpu.memory_space<vmem>>, %arg5: memref<8x8xf32, #tpu.memory_space<vmem>>, %arg6: memref<8x8xf32, #tpu.memory_space<vmem>>, %arg7: memref<8x8xf32, #tpu.memory_space<vmem>>, %arg8: memref<4x8xf32, #tpu.memory_space<vmem>>, %arg9: memref<1x16x8xf32, #tpu.memory_space<vmem>>, %arg10: memref<1x32x8xf32, #tpu.memory_space<vmem>>) attributes {dimension_semantics = [#tpu.dimension_semantics<parallel>], iteration_bounds = array<i64: 2>, scalar_prefetch = 0 : i64, scratch_operands = 1 : i64, tpu.core_type = #tpu.core_type<tc>, window_params = [{transform_indices = @transform_0, window_bounds = array<i64: 1, 16, 4>}, {transform_indices = @transform_1, window_bounds = array<i64: 1, 1, 16>}, {pipeline_mode = #tpu.pipeline_mode<synchronous>, transform_indices = @transform_2, window_bounds = array<i64: 12, 8>}, {pipeline_mode = #tpu.pipeline_mode<synchronous>, transform_indices = @transform_3, window_bounds = array<i64: 24, 8>}, {pipeline_mode = #tpu.pipeline_mode<synchronous>, transform_indices = @transform_4, window_bounds = array<i64: 8, 8>}, {pipeline_mode = #tpu.pipeline_mode<synchronous>, transform_indices = @transform_5, window_bounds = array<i64: 8, 8>}, {pipeline_mode = #tpu.pipeline_mode<synchronous>, transform_indices = @transform_6, window_bounds = array<i64: 8, 8>}, {pipeline_mode = #tpu.pipeline_mode<synchronous>, transform_indices = @transform_7, window_bounds = array<i64: 4, 8>}, {transform_indices = @transform_8, window_bounds = array<i64: 1, 16, 8>}]} {
    %c0 = arith.constant 0 : index
    %c0_0 = arith.constant 0 : index
    %0 = vector.load %arg6[%c0, %c0_0] : memref<8x8xf32, #tpu.memory_space<vmem>>, vector<8x8xf32>
    %c0_1 = arith.constant 0 : index
    %c0_2 = arith.constant 0 : index
    %1 = vector.load %arg7[%c0_1, %c0_2] : memref<8x8xf32, #tpu.memory_space<vmem>>, vector<8x8xf32>
    %c0_3 = arith.constant 0 : index
    %c0_4 = arith.constant 0 : index
    %2 = vector.load %arg5[%c0_3, %c0_4] : memref<8x8xf32, #tpu.memory_space<vmem>>, vector<1x8xf32>
    %c1 = arith.constant 1 : index
    %c0_5 = arith.constant 0 : index
    %3 = vector.load %arg5[%c1, %c0_5] : memref<8x8xf32, #tpu.memory_space<vmem>>, vector<1x8xf32>
    %c2 = arith.constant 2 : index
    %c0_6 = arith.constant 0 : index
    %4 = vector.load %arg5[%c2, %c0_6] : memref<8x8xf32, #tpu.memory_space<vmem>>, vector<1x8xf32>
    %c3 = arith.constant 3 : index
    %c0_7 = arith.constant 0 : index
    %5 = vector.load %arg5[%c3, %c0_7] : memref<8x8xf32, #tpu.memory_space<vmem>>, vector<1x8xf32>
    %c4 = arith.constant 4 : index
    %c0_8 = arith.constant 0 : index
    %6 = vector.load %arg5[%c4, %c0_8] : memref<8x8xf32, #tpu.memory_space<vmem>>, vector<1x8xf32>
    %c5 = arith.constant 5 : index
    %c0_9 = arith.constant 0 : index
    %7 = vector.load %arg5[%c5, %c0_9] : memref<8x8xf32, #tpu.memory_space<vmem>>, vector<1x8xf32>
    %c6 = arith.constant 6 : index
    %c0_10 = arith.constant 0 : index
    %8 = vector.load %arg5[%c6, %c0_10] : memref<8x8xf32, #tpu.memory_space<vmem>>, vector<1x8xf32>
    %c0_11 = arith.constant 0 : index
    %c0_12 = arith.constant 0 : index
    %c0_13 = arith.constant 0 : index
    %9 = vector.load %arg2[%c0_11, %c0_12, %c0_13] : memref<1x1x16xf32, #tpu.memory_space<vmem>>, vector<1x1x16xf32>
    %10 = vector.shape_cast %9 : vector<1x1x16xf32> to vector<1x16xf32>
    %11 = vector.extract_strided_slice %10 {offsets = [0, 0], sizes = [1, 8], strides = [1, 1]} : vector<1x16xf32> to vector<1x8xf32>
    %12 = vector.extract_strided_slice %10 {offsets = [0, 8], sizes = [1, 8], strides = [1, 1]} : vector<1x16xf32> to vector<1x8xf32>
    %cst = arith.constant 0.000000e+00 : f32
    %13 = vector.broadcast %cst : f32 to vector<1x1x8xf32>
    %c0_14 = arith.constant 0 : index
    %c7 = arith.constant 7 : index
    %c0_15 = arith.constant 0 : index
    %14 = vector.load %arg10[%c0_14, %c7, %c0_15] : memref<1x32x8xf32, #tpu.memory_space<vmem>>, vector<1x1x8xf32>
    tpu.vector_store %arg10[%c0_14, %c7, %c0_15], %13 {strides = array<i32>} : memref<1x32x8xf32, #tpu.memory_space<vmem>>, vector<1x1x8xf32>,
    %c0_16 = arith.constant 0 : index
    %c24 = arith.constant 24 : index
    %c0_17 = arith.constant 0 : index
    %15 = vector.load %arg10[%c0_16, %c24, %c0_17] : memref<1x32x8xf32, #tpu.memory_space<vmem>>, vector<1x1x8xf32>
    tpu.vector_store %arg10[%c0_16, %c24, %c0_17], %13 {strides = array<i32>} : memref<1x32x8xf32, #tpu.memory_space<vmem>>, vector<1x1x8xf32>,
    %c0_18 = arith.constant 0 : index
    %c0_19 = arith.constant 0 : index
    %c0_20 = arith.constant 0 : index
    %16 = vector.load %arg1[%c0_18, %c0_19, %c0_20] : memref<1x16x4xf32, #tpu.memory_space<vmem>>, vector<1x16x4xf32>
    %c0_21 = arith.constant 0 : index
    %c8 = arith.constant 8 : index
    %c0_22 = arith.constant 0 : index
    %17 = vector.load %arg10[%c0_21, %c8, %c0_22] : memref<1x32x8xf32, #tpu.memory_space<vmem>>, vector<1x16x4xf32>
    tpu.vector_store %arg10[%c0_21, %c8, %c0_22], %16 {strides = array<i32>} : memref<1x32x8xf32, #tpu.memory_space<vmem>>, vector<1x16x4xf32>,
    %c0_23 = arith.constant 0 : index
    %c7_24 = arith.constant 7 : index
    %c0_25 = arith.constant 0 : index
    %18 = vector.load %arg10[%c0_23, %c7_24, %c0_25] : memref<1x32x8xf32, #tpu.memory_space<vmem>>, vector<1x16x4xf32>
    %c0_26 = arith.constant 0 : index
    %c9 = arith.constant 9 : index
    %c0_27 = arith.constant 0 : index
    %19 = vector.load %arg10[%c0_26, %c9, %c0_27] : memref<1x32x8xf32, #tpu.memory_space<vmem>>, vector<1x16x4xf32>
    %20 = tpu.concatenate %18, %16, %19 in 2 : vector<1x16x4xf32>, vector<1x16x4xf32>, vector<1x16x4xf32> -> vector<1x16x12xf32>
    %21 = vector.shape_cast %20 : vector<1x16x12xf32> to vector<16x12xf32>
    %c0_28 = arith.constant 0 : index
    %c0_29 = arith.constant 0 : index
    %22 = vector.load %arg3[%c0_28, %c0_29] : memref<12x8xf32, #tpu.memory_space<vmem>>, vector<12x8xf32>
    %cst_30 = arith.constant dense<0.000000e+00> : vector<16x8xf32>
    %23 = tpu.matmul %21, %22, %cst_30 {dimension_numbers = #tpu.dot_dimension_numbers<[1], [0], [0], [1], [0, 0, 1, 1], [], []>} : vector<16x12xf32>, vector<12x8xf32>, vector<16x8xf32> -> vector<16x8xf32>
    %24 = vector.broadcast %2 : vector<1x8xf32> to vector<16x8xf32>
    %25 = arith.addf %23, %24 : vector<16x8xf32>
    %26 = vector.shape_cast %25 : vector<16x8xf32> to vector<1x16x8xf32>
    %27 = arith.mulf %3, %11 : vector<1x8xf32>
    %28 = arith.mulf %4, %11 : vector<1x8xf32>
    %29 = arith.addf %28, %12 : vector<1x8xf32>
    %cst_31 = arith.constant dense<0.000000e+00> : vector<1x8xf32>
    %30 = vector.multi_reduction <add>, %26, %cst_31 [1] : vector<1x16x8xf32> to vector<1x8xf32>
    %31 = arith.mulf %26, %26 : vector<1x16x8xf32>
    %cst_32 = arith.constant dense<0.000000e+00> : vector<1x8xf32>
    %32 = vector.multi_reduction <add>, %31, %cst_32 [1] : vector<1x16x8xf32> to vector<1x8xf32>
    %cst_33 = arith.constant dense<0.000000e+00> : vector<1x8xf32>
    %33 = tpu.matmul %30, %0, %cst_33 {dimension_numbers = #tpu.dot_dimension_numbers<[1], [0], [0], [1], [0, 0, 1, 1], [], []>} : vector<1x8xf32>, vector<8x8xf32>, vector<1x8xf32> -> vector<1x8xf32>
    %cst_34 = arith.constant 6.250000e-02 : f32
    %34 = vector.broadcast %cst_34 : f32 to vector<1x8xf32>
    %35 = arith.mulf %33, %34 : vector<1x8xf32>
    %cst_35 = arith.constant dense<0.000000e+00> : vector<1x8xf32>
    %36 = tpu.matmul %32, %0, %cst_35 {dimension_numbers = #tpu.dot_dimension_numbers<[1], [0], [0], [1], [0, 0, 1, 1], [], []>} : vector<1x8xf32>, vector<8x8xf32>, vector<1x8xf32> -> vector<1x8xf32>
    %cst_36 = arith.constant 6.250000e-02 : f32
    %37 = vector.broadcast %cst_36 : f32 to vector<1x8xf32>
    %38 = arith.mulf %36, %37 : vector<1x8xf32>
    %39 = arith.mulf %35, %35 : vector<1x8xf32>
    %40 = arith.subf %38, %39 : vector<1x8xf32>
    %cst_37 = arith.constant 0.000000e+00 : f32
    %41 = vector.broadcast %cst_37 : f32 to vector<1x8xf32>
    %42 = arith.maximumf %40, %41 : vector<1x8xf32>
    %cst_38 = arith.constant 9.99999974E-6 : f32
    %43 = vector.broadcast %cst_38 : f32 to vector<1x8xf32>
    %44 = arith.addf %42, %43 : vector<1x8xf32>
    %45 = math.rsqrt %44 : vector<1x8xf32>
    %cst_39 = arith.constant dense<0.000000e+00> : vector<1x8xf32>
    %46 = tpu.matmul %35, %1, %cst_39 {dimension_numbers = #tpu.dot_dimension_numbers<[1], [0], [0], [1], [0, 0, 1, 1], [], []>} : vector<1x8xf32>, vector<8x8xf32>, vector<1x8xf32> -> vector<1x8xf32>
    %cst_40 = arith.constant dense<0.000000e+00> : vector<1x8xf32>
    %47 = tpu.matmul %45, %1, %cst_40 {dimension_numbers = #tpu.dot_dimension_numbers<[1], [0], [0], [1], [0, 0, 1, 1], [], []>} : vector<1x8xf32>, vector<8x8xf32>, vector<1x8xf32> -> vector<1x8xf32>
    %48 = arith.mulf %47, %27 : vector<1x8xf32>
    %49 = arith.mulf %46, %48 : vector<1x8xf32>
    %50 = arith.subf %29, %49 : vector<1x8xf32>
    %51 = vector.shape_cast %48 : vector<1x8xf32> to vector<1x1x8xf32>
    %52 = vector.broadcast %51 : vector<1x1x8xf32> to vector<1x16x8xf32>
    %53 = arith.mulf %26, %52 : vector<1x16x8xf32>
    %54 = vector.shape_cast %50 : vector<1x8xf32> to vector<1x1x8xf32>
    %55 = vector.broadcast %54 : vector<1x1x8xf32> to vector<1x16x8xf32>
    %56 = arith.addf %53, %55 : vector<1x16x8xf32>
    %57 = arith.negf %56 : vector<1x16x8xf32>
    %58 = math.exp %57 : vector<1x16x8xf32>
    %cst_41 = arith.constant 1.000000e+00 : f32
    %59 = vector.broadcast %cst_41 : f32 to vector<1x16x8xf32>
    %60 = arith.addf %59, %58 : vector<1x16x8xf32>
    %61 = arith.divf %59, %60 : vector<1x16x8xf32>
    %62 = arith.mulf %56, %61 : vector<1x16x8xf32>
    %c0_42 = arith.constant 0 : index
    %c8_43 = arith.constant 8 : index
    %c0_44 = arith.constant 0 : index
    %63 = vector.load %arg10[%c0_42, %c8_43, %c0_44] : memref<1x32x8xf32, #tpu.memory_space<vmem>>, vector<1x16x8xf32>
    tpu.vector_store %arg10[%c0_42, %c8_43, %c0_44], %62 {strides = array<i32>} : memref<1x32x8xf32, #tpu.memory_space<vmem>>, vector<1x16x8xf32>,
    %c0_45 = arith.constant 0 : index
    %c7_46 = arith.constant 7 : index
    %c0_47 = arith.constant 0 : index
    %64 = vector.load %arg10[%c0_45, %c7_46, %c0_47] : memref<1x32x8xf32, #tpu.memory_space<vmem>>, vector<1x16x8xf32>
    %c0_48 = arith.constant 0 : index
    %c9_49 = arith.constant 9 : index
    %c0_50 = arith.constant 0 : index
    %65 = vector.load %arg10[%c0_48, %c9_49, %c0_50] : memref<1x32x8xf32, #tpu.memory_space<vmem>>, vector<1x16x8xf32>
    %66 = tpu.concatenate %64, %62, %65 in 2 : vector<1x16x8xf32>, vector<1x16x8xf32>, vector<1x16x8xf32> -> vector<1x16x24xf32>
    %67 = vector.shape_cast %66 : vector<1x16x24xf32> to vector<16x24xf32>
    %c0_51 = arith.constant 0 : index
    %c0_52 = arith.constant 0 : index
    %68 = vector.load %arg4[%c0_51, %c0_52] : memref<24x8xf32, #tpu.memory_space<vmem>>, vector<24x8xf32>
    %cst_53 = arith.constant dense<0.000000e+00> : vector<16x8xf32>
    %69 = tpu.matmul %67, %68, %cst_53 {dimension_numbers = #tpu.dot_dimension_numbers<[1], [0], [0], [1], [0, 0, 1, 1], [], []>} : vector<16x24xf32>, vector<24x8xf32>, vector<16x8xf32> -> vector<16x8xf32>
    %70 = vector.broadcast %5 : vector<1x8xf32> to vector<16x8xf32>
    %71 = arith.addf %69, %70 : vector<16x8xf32>
    %72 = vector.shape_cast %71 : vector<16x8xf32> to vector<1x16x8xf32>
    %cst_54 = arith.constant dense<0.000000e+00> : vector<1x8xf32>
    %73 = vector.multi_reduction <add>, %72, %cst_54 [1] : vector<1x16x8xf32> to vector<1x8xf32>
    %74 = arith.mulf %72, %72 : vector<1x16x8xf32>
    %cst_55 = arith.constant dense<0.000000e+00> : vector<1x8xf32>
    %75 = vector.multi_reduction <add>, %74, %cst_55 [1] : vector<1x16x8xf32> to vector<1x8xf32>
    %cst_56 = arith.constant dense<0.000000e+00> : vector<1x8xf32>
    %76 = tpu.matmul %73, %0, %cst_56 {dimension_numbers = #tpu.dot_dimension_numbers<[1], [0], [0], [1], [0, 0, 1, 1], [], []>} : vector<1x8xf32>, vector<8x8xf32>, vector<1x8xf32> -> vector<1x8xf32>
    %cst_57 = arith.constant 6.250000e-02 : f32
    %77 = vector.broadcast %cst_57 : f32 to vector<1x8xf32>
    %78 = arith.mulf %76, %77 : vector<1x8xf32>
    %cst_58 = arith.constant dense<0.000000e+00> : vector<1x8xf32>
    %79 = tpu.matmul %75, %0, %cst_58 {dimension_numbers = #tpu.dot_dimension_numbers<[1], [0], [0], [1], [0, 0, 1, 1], [], []>} : vector<1x8xf32>, vector<8x8xf32>, vector<1x8xf32> -> vector<1x8xf32>
    %cst_59 = arith.constant 6.250000e-02 : f32
    %80 = vector.broadcast %cst_59 : f32 to vector<1x8xf32>
    %81 = arith.mulf %79, %80 : vector<1x8xf32>
    %82 = arith.mulf %78, %78 : vector<1x8xf32>
    %83 = arith.subf %81, %82 : vector<1x8xf32>
    %cst_60 = arith.constant 0.000000e+00 : f32
    %84 = vector.broadcast %cst_60 : f32 to vector<1x8xf32>
    %85 = arith.maximumf %83, %84 : vector<1x8xf32>
    %cst_61 = arith.constant 9.99999974E-6 : f32
    %86 = vector.broadcast %cst_61 : f32 to vector<1x8xf32>
    %87 = arith.addf %85, %86 : vector<1x8xf32>
    %88 = math.rsqrt %87 : vector<1x8xf32>
    %cst_62 = arith.constant dense<0.000000e+00> : vector<1x8xf32>
    %89 = tpu.matmul %78, %1, %cst_62 {dimension_numbers = #tpu.dot_dimension_numbers<[1], [0], [0], [1], [0, 0, 1, 1], [], []>} : vector<1x8xf32>, vector<8x8xf32>, vector<1x8xf32> -> vector<1x8xf32>
    %cst_63 = arith.constant dense<0.000000e+00> : vector<1x8xf32>
    %90 = tpu.matmul %88, %1, %cst_63 {dimension_numbers = #tpu.dot_dimension_numbers<[1], [0], [0], [1], [0, 0, 1, 1], [], []>} : vector<1x8xf32>, vector<8x8xf32>, vector<1x8xf32> -> vector<1x8xf32>
    %91 = arith.mulf %90, %6 : vector<1x8xf32>
    %92 = arith.mulf %89, %91 : vector<1x8xf32>
    %93 = arith.subf %7, %92 : vector<1x8xf32>
    %94 = vector.shape_cast %91 : vector<1x8xf32> to vector<1x1x8xf32>
    %95 = vector.broadcast %94 : vector<1x1x8xf32> to vector<1x16x8xf32>
    %96 = arith.mulf %72, %95 : vector<1x16x8xf32>
    %97 = vector.shape_cast %93 : vector<1x8xf32> to vector<1x1x8xf32>
    %98 = vector.broadcast %97 : vector<1x1x8xf32> to vector<1x16x8xf32>
    %99 = arith.addf %96, %98 : vector<1x16x8xf32>
    %100 = arith.negf %99 : vector<1x16x8xf32>
    %101 = math.exp %100 : vector<1x16x8xf32>
    %cst_64 = arith.constant 1.000000e+00 : f32
    %102 = vector.broadcast %cst_64 : f32 to vector<1x16x8xf32>
    %103 = arith.addf %102, %101 : vector<1x16x8xf32>
    %104 = arith.divf %102, %103 : vector<1x16x8xf32>
    %105 = arith.mulf %99, %104 : vector<1x16x8xf32>
    %106 = vector.shape_cast %16 : vector<1x16x4xf32> to vector<16x4xf32>
    %c0_65 = arith.constant 0 : index
    %c0_66 = arith.constant 0 : index
    %107 = vector.load %arg8[%c0_65, %c0_66] : memref<4x8xf32, #tpu.memory_space<vmem>>, vector<4x8xf32>
    %cst_67 = arith.constant dense<0.000000e+00> : vector<16x8xf32>
    %108 = tpu.matmul %106, %107, %cst_67 {dimension_numbers = #tpu.dot_dimension_numbers<[1], [0], [0], [1], [0, 0, 1, 1], [], []>} : vector<16x4xf32>, vector<4x8xf32>, vector<16x8xf32> -> vector<16x8xf32>
    %109 = vector.broadcast %8 : vector<1x8xf32> to vector<16x8xf32>
    %110 = arith.addf %108, %109 : vector<16x8xf32>
    %111 = vector.shape_cast %110 : vector<16x8xf32> to vector<1x16x8xf32>
    %112 = arith.addf %105, %111 : vector<1x16x8xf32>
    %c0_68 = arith.constant 0 : index
    %c0_69 = arith.constant 0 : index
    %c0_70 = arith.constant 0 : index
    %113 = vector.load %arg9[%c0_68, %c0_69, %c0_70] : memref<1x16x8xf32, #tpu.memory_space<vmem>>, vector<1x16x8xf32>
    tpu.vector_store %arg9[%c0_68, %c0_69, %c0_70], %112 {strides = array<i32>} : memref<1x16x8xf32, #tpu.memory_space<vmem>>, vector<1x16x8xf32>,
    return
  }
  func.func @transform_0(%arg0: i32) -> (i32, i32, i32) {
    %c0_i32 = arith.constant 0 : i32
    %c0_i32_0 = arith.constant 0 : i32
    %c0_i32_1 = arith.constant 0 : i32
    return %arg0, %c0_i32, %c0_i32_0 : i32, i32, i32
  }
  func.func @transform_1(%arg0: i32) -> (i32, i32, i32) {
    %c0_i32 = arith.constant 0 : i32
    %c0_i32_0 = arith.constant 0 : i32
    %c0_i32_1 = arith.constant 0 : i32
    return %arg0, %c0_i32, %c0_i32_0 : i32, i32, i32
  }
  func.func @transform_2(%arg0: i32) -> (i32, i32) {
    %c0_i32 = arith.constant 0 : i32
    %c0_i32_0 = arith.constant 0 : i32
    %c0_i32_1 = arith.constant 0 : i32
    return %c0_i32, %c0_i32_0 : i32, i32
  }
  func.func @transform_3(%arg0: i32) -> (i32, i32) {
    %c0_i32 = arith.constant 0 : i32
    %c0_i32_0 = arith.constant 0 : i32
    %c0_i32_1 = arith.constant 0 : i32
    return %c0_i32, %c0_i32_0 : i32, i32
  }
  func.func @transform_4(%arg0: i32) -> (i32, i32) {
    %c0_i32 = arith.constant 0 : i32
    %c0_i32_0 = arith.constant 0 : i32
    %c0_i32_1 = arith.constant 0 : i32
    return %c0_i32, %c0_i32_0 : i32, i32
  }
  func.func @transform_5(%arg0: i32) -> (i32, i32) {
    %c0_i32 = arith.constant 0 : i32
    %c0_i32_0 = arith.constant 0 : i32
    %c0_i32_1 = arith.constant 0 : i32
    return %c0_i32, %c0_i32_0 : i32, i32
  }
  func.func @transform_6(%arg0: i32) -> (i32, i32) {
    %c0_i32 = arith.constant 0 : i32
    %c0_i32_0 = arith.constant 0 : i32
    %c0_i32_1 = arith.constant 0 : i32
    return %c0_i32, %c0_i32_0 : i32, i32
  }
  func.func @transform_7(%arg0: i32) -> (i32, i32) {
    %c0_i32 = arith.constant 0 : i32
    %c0_i32_0 = arith.constant 0 : i32
    %c0_i32_1 = arith.constant 0 : i32
    return %c0_i32, %c0_i32_0 : i32, i32
  }
  func.func @transform_8(%arg0: i32) -> (i32, i32, i32) {
    %c0_i32 = arith.constant 0 : i32
    %c0_i32_0 = arith.constant 0 : i32
    %c0_i32_1 = arith.constant 0 : i32
    return %arg0, %c0_i32, %c0_i32_0 : i32, i32, i32
  }
}

module attributes {stable_mosaic.version = 11 : i64} {
  func.func @resnet_block_kernel(%arg0: i32, %arg1: memref<1x16x4xf32, #tpu.memory_space<vmem>>, %arg2: memref<1x1x16xf32, #tpu.memory_space<vmem>>, %arg3: memref<12x8xf32, #tpu.memory_space<vmem>>, %arg4: memref<24x8xf32, #tpu.memory_space<vmem>>, %arg5: memref<8x8xf32, #tpu.memory_space<vmem>>, %arg6: memref<8x8xf32, #tpu.memory_space<vmem>>, %arg7: memref<8x8xf32, #tpu.memory_space<vmem>>, %arg8: memref<4x8xf32, #tpu.memory_space<vmem>>, %arg9: memref<1x16x8xf32, #tpu.memory_space<vmem>>, %arg10: memref<1x32x8xf32, #tpu.memory_space<vmem>>) attributes {dimension_semantics = [#tpu.dimension_semantics<parallel>], iteration_bounds = array<i64: 2>, scalar_prefetch = 0 : i64, scratch_operands = 1 : i64, tpu.core_type = #tpu.core_type<tc>, window_params = [{transform_indices = @transform_0, window_bounds = array<i64: 1, 16, 4>}, {transform_indices = @transform_1, window_bounds = array<i64: 1, 1, 16>}, {pipeline_mode = #tpu.pipeline_mode<synchronous>, transform_indices = @transform_2, window_bounds = array<i64: 12, 8>}, {pipeline_mode = #tpu.pipeline_mode<synchronous>, transform_indices = @transform_3, window_bounds = array<i64: 24, 8>}, {pipeline_mode = #tpu.pipeline_mode<synchronous>, transform_indices = @transform_4, window_bounds = array<i64: 8, 8>}, {pipeline_mode = #tpu.pipeline_mode<synchronous>, transform_indices = @transform_5, window_bounds = array<i64: 8, 8>}, {pipeline_mode = #tpu.pipeline_mode<synchronous>, transform_indices = @transform_6, window_bounds = array<i64: 8, 8>}, {pipeline_mode = #tpu.pipeline_mode<synchronous>, transform_indices = @transform_7, window_bounds = array<i64: 4, 8>}, {transform_indices = @transform_8, window_bounds = array<i64: 1, 16, 8>}]} {
    %c0 = arith.constant 0 : index
    %c0_0 = arith.constant 0 : index
    %0 = vector.load %arg6[%c0, %c0_0] : memref<8x8xf32, #tpu.memory_space<vmem>>, vector<8x8xf32>
    %c0_1 = arith.constant 0 : index
    %c0_2 = arith.constant 0 : index
    %1 = vector.load %arg7[%c0_1, %c0_2] : memref<8x8xf32, #tpu.memory_space<vmem>>, vector<8x8xf32>
    %c0_3 = arith.constant 0 : index
    %c0_4 = arith.constant 0 : index
    %2 = vector.load %arg5[%c0_3, %c0_4] : memref<8x8xf32, #tpu.memory_space<vmem>>, vector<1x8xf32>
    %c1 = arith.constant 1 : index
    %c0_5 = arith.constant 0 : index
    %3 = vector.load %arg5[%c1, %c0_5] : memref<8x8xf32, #tpu.memory_space<vmem>>, vector<1x8xf32>
    %c2 = arith.constant 2 : index
    %c0_6 = arith.constant 0 : index
    %4 = vector.load %arg5[%c2, %c0_6] : memref<8x8xf32, #tpu.memory_space<vmem>>, vector<1x8xf32>
    %c3 = arith.constant 3 : index
    %c0_7 = arith.constant 0 : index
    %5 = vector.load %arg5[%c3, %c0_7] : memref<8x8xf32, #tpu.memory_space<vmem>>, vector<1x8xf32>
    %c4 = arith.constant 4 : index
    %c0_8 = arith.constant 0 : index
    %6 = vector.load %arg5[%c4, %c0_8] : memref<8x8xf32, #tpu.memory_space<vmem>>, vector<1x8xf32>
    %c5 = arith.constant 5 : index
    %c0_9 = arith.constant 0 : index
    %7 = vector.load %arg5[%c5, %c0_9] : memref<8x8xf32, #tpu.memory_space<vmem>>, vector<1x8xf32>
    %c6 = arith.constant 6 : index
    %c0_10 = arith.constant 0 : index
    %8 = vector.load %arg5[%c6, %c0_10] : memref<8x8xf32, #tpu.memory_space<vmem>>, vector<1x8xf32>
    %c0_11 = arith.constant 0 : index
    %c0_12 = arith.constant 0 : index
    %c0_13 = arith.constant 0 : index
    %9 = vector.load %arg2[%c0_11, %c0_12, %c0_13] : memref<1x1x16xf32, #tpu.memory_space<vmem>>, vector<1x1x16xf32>
    %10 = vector.shape_cast %9 : vector<1x1x16xf32> to vector<1x16xf32>
    %11 = vector.extract_strided_slice %10 {offsets = [0, 0], sizes = [1, 8], strides = [1, 1]} : vector<1x16xf32> to vector<1x8xf32>
    %12 = vector.extract_strided_slice %10 {offsets = [0, 8], sizes = [1, 8], strides = [1, 1]} : vector<1x16xf32> to vector<1x8xf32>
    %cst = arith.constant 0.000000e+00 : f32
    %13 = vector.broadcast %cst : f32 to vector<1x1x8xf32>
    %c0_14 = arith.constant 0 : index
    %c7 = arith.constant 7 : index
    %c0_15 = arith.constant 0 : index
    %14 = vector.load %arg10[%c0_14, %c7, %c0_15] : memref<1x32x8xf32, #tpu.memory_space<vmem>>, vector<1x1x8xf32>
    tpu.vector_store %arg10[%c0_14, %c7, %c0_15], %13 {strides = array<i32>} : memref<1x32x8xf32, #tpu.memory_space<vmem>>, vector<1x1x8xf32>,
    %c0_16 = arith.constant 0 : index
    %c24 = arith.constant 24 : index
    %c0_17 = arith.constant 0 : index
    %15 = vector.load %arg10[%c0_16, %c24, %c0_17] : memref<1x32x8xf32, #tpu.memory_space<vmem>>, vector<1x1x8xf32>
    tpu.vector_store %arg10[%c0_16, %c24, %c0_17], %13 {strides = array<i32>} : memref<1x32x8xf32, #tpu.memory_space<vmem>>, vector<1x1x8xf32>,
    %c0_18 = arith.constant 0 : index
    %c0_19 = arith.constant 0 : index
    %c0_20 = arith.constant 0 : index
    %16 = vector.load %arg1[%c0_18, %c0_19, %c0_20] : memref<1x16x4xf32, #tpu.memory_space<vmem>>, vector<1x16x4xf32>
    %c0_21 = arith.constant 0 : index
    %c8 = arith.constant 8 : index
    %c0_22 = arith.constant 0 : index
    %17 = vector.load %arg10[%c0_21, %c8, %c0_22] : memref<1x32x8xf32, #tpu.memory_space<vmem>>, vector<1x16x4xf32>
    tpu.vector_store %arg10[%c0_21, %c8, %c0_22], %16 {strides = array<i32>} : memref<1x32x8xf32, #tpu.memory_space<vmem>>, vector<1x16x4xf32>,
    %c0_23 = arith.constant 0 : index
    %c7_24 = arith.constant 7 : index
    %c0_25 = arith.constant 0 : index
    %18 = vector.load %arg10[%c0_23, %c7_24, %c0_25] : memref<1x32x8xf32, #tpu.memory_space<vmem>>, vector<1x16x4xf32>
    %c0_26 = arith.constant 0 : index
    %c9 = arith.constant 9 : index
    %c0_27 = arith.constant 0 : index
    %19 = vector.load %arg10[%c0_26, %c9, %c0_27] : memref<1x32x8xf32, #tpu.memory_space<vmem>>, vector<1x16x4xf32>
    %20 = tpu.concatenate %18, %16, %19 in 2 : vector<1x16x4xf32>, vector<1x16x4xf32>, vector<1x16x4xf32> -> vector<1x16x12xf32>
    %21 = vector.shape_cast %20 : vector<1x16x12xf32> to vector<16x12xf32>
    %c0_28 = arith.constant 0 : index
    %c0_29 = arith.constant 0 : index
    %22 = vector.load %arg3[%c0_28, %c0_29] : memref<12x8xf32, #tpu.memory_space<vmem>>, vector<12x8xf32>
    %cst_30 = arith.constant dense<0.000000e+00> : vector<16x8xf32>
    %23 = tpu.matmul %21, %22, %cst_30 {dimension_numbers = #tpu.dot_dimension_numbers<[1], [0], [0], [1], [0, 0, 1, 1], [], []>} : vector<16x12xf32>, vector<12x8xf32>, vector<16x8xf32> -> vector<16x8xf32>
    %24 = vector.broadcast %2 : vector<1x8xf32> to vector<16x8xf32>
    %25 = arith.addf %23, %24 : vector<16x8xf32>
    %26 = vector.shape_cast %25 : vector<16x8xf32> to vector<1x16x8xf32>
    %27 = arith.mulf %3, %11 : vector<1x8xf32>
    %28 = arith.mulf %4, %11 : vector<1x8xf32>
    %29 = arith.addf %28, %12 : vector<1x8xf32>
    %cst_31 = arith.constant dense<0.000000e+00> : vector<1x8xf32>
    %30 = vector.multi_reduction <add>, %26, %cst_31 [1] : vector<1x16x8xf32> to vector<1x8xf32>
    %31 = arith.mulf %26, %26 : vector<1x16x8xf32>
    %cst_32 = arith.constant dense<0.000000e+00> : vector<1x8xf32>
    %32 = vector.multi_reduction <add>, %31, %cst_32 [1] : vector<1x16x8xf32> to vector<1x8xf32>
    %cst_33 = arith.constant dense<0.000000e+00> : vector<1x8xf32>
    %33 = tpu.matmul %30, %0, %cst_33 {dimension_numbers = #tpu.dot_dimension_numbers<[1], [0], [0], [1], [0, 0, 1, 1], [], []>} : vector<1x8xf32>, vector<8x8xf32>, vector<1x8xf32> -> vector<1x8xf32>
    %cst_34 = arith.constant 6.250000e-02 : f32
    %34 = vector.broadcast %cst_34 : f32 to vector<1x8xf32>
    %35 = arith.mulf %33, %34 : vector<1x8xf32>
    %cst_35 = arith.constant dense<0.000000e+00> : vector<1x8xf32>
    %36 = tpu.matmul %32, %0, %cst_35 {dimension_numbers = #tpu.dot_dimension_numbers<[1], [0], [0], [1], [0, 0, 1, 1], [], []>} : vector<1x8xf32>, vector<8x8xf32>, vector<1x8xf32> -> vector<1x8xf32>
    %cst_36 = arith.constant 6.250000e-02 : f32
    %37 = vector.broadcast %cst_36 : f32 to vector<1x8xf32>
    %38 = arith.mulf %36, %37 : vector<1x8xf32>
    %39 = arith.mulf %35, %35 : vector<1x8xf32>
    %40 = arith.subf %38, %39 : vector<1x8xf32>
    %cst_37 = arith.constant 0.000000e+00 : f32
    %41 = vector.broadcast %cst_37 : f32 to vector<1x8xf32>
    %42 = arith.maximumf %40, %41 : vector<1x8xf32>
    %cst_38 = arith.constant 9.99999974E-6 : f32
    %43 = vector.broadcast %cst_38 : f32 to vector<1x8xf32>
    %44 = arith.addf %42, %43 : vector<1x8xf32>
    %45 = math.rsqrt %44 : vector<1x8xf32>
    %cst_39 = arith.constant dense<0.000000e+00> : vector<1x8xf32>
    %46 = tpu.matmul %35, %1, %cst_39 {dimension_numbers = #tpu.dot_dimension_numbers<[1], [0], [0], [1], [0, 0, 1, 1], [], []>} : vector<1x8xf32>, vector<8x8xf32>, vector<1x8xf32> -> vector<1x8xf32>
    %cst_40 = arith.constant dense<0.000000e+00> : vector<1x8xf32>
    %47 = tpu.matmul %45, %1, %cst_40 {dimension_numbers = #tpu.dot_dimension_numbers<[1], [0], [0], [1], [0, 0, 1, 1], [], []>} : vector<1x8xf32>, vector<8x8xf32>, vector<1x8xf32> -> vector<1x8xf32>
    %48 = arith.mulf %47, %27 : vector<1x8xf32>
    %49 = arith.mulf %46, %48 : vector<1x8xf32>
    %50 = arith.subf %29, %49 : vector<1x8xf32>
    %51 = vector.shape_cast %48 : vector<1x8xf32> to vector<1x1x8xf32>
    %52 = vector.broadcast %51 : vector<1x1x8xf32> to vector<1x16x8xf32>
    %53 = arith.mulf %26, %52 : vector<1x16x8xf32>
    %54 = vector.shape_cast %50 : vector<1x8xf32> to vector<1x1x8xf32>
    %55 = vector.broadcast %54 : vector<1x1x8xf32> to vector<1x16x8xf32>
    %56 = arith.addf %53, %55 : vector<1x16x8xf32>
    %57 = arith.negf %56 : vector<1x16x8xf32>
    %58 = math.exp %57 : vector<1x16x8xf32>
    %cst_41 = arith.constant 1.000000e+00 : f32
    %59 = vector.broadcast %cst_41 : f32 to vector<1x16x8xf32>
    %60 = arith.addf %59, %58 : vector<1x16x8xf32>
    %61 = arith.divf %59, %60 : vector<1x16x8xf32>
    %62 = arith.mulf %56, %61 : vector<1x16x8xf32>
    %c0_42 = arith.constant 0 : index
    %c8_43 = arith.constant 8 : index
    %c0_44 = arith.constant 0 : index
    %63 = vector.load %arg10[%c0_42, %c8_43, %c0_44] : memref<1x32x8xf32, #tpu.memory_space<vmem>>, vector<1x16x8xf32>
    tpu.vector_store %arg10[%c0_42, %c8_43, %c0_44], %62 {strides = array<i32>} : memref<1x32x8xf32, #tpu.memory_space<vmem>>, vector<1x16x8xf32>,
    %c0_45 = arith.constant 0 : index
    %c7_46 = arith.constant 7 : index
    %c0_47 = arith.constant 0 : index
    %64 = vector.load %arg10[%c0_45, %c7_46, %c0_47] : memref<1x32x8xf32, #tpu.memory_space<vmem>>, vector<1x16x8xf32>
    %c0_48 = arith.constant 0 : index
    %c9_49 = arith.constant 9 : index
    %c0_50 = arith.constant 0 : index
    %65 = vector.load %arg10[%c0_48, %c9_49, %c0_50] : memref<1x32x8xf32, #tpu.memory_space<vmem>>, vector<1x16x8xf32>
    %66 = tpu.concatenate %64, %62, %65 in 2 : vector<1x16x8xf32>, vector<1x16x8xf32>, vector<1x16x8xf32> -> vector<1x16x24xf32>
    %67 = vector.shape_cast %66 : vector<1x16x24xf32> to vector<16x24xf32>
    %c0_51 = arith.constant 0 : index
    %c0_52 = arith.constant 0 : index
    %68 = vector.load %arg4[%c0_51, %c0_52] : memref<24x8xf32, #tpu.memory_space<vmem>>, vector<24x8xf32>
    %cst_53 = arith.constant dense<0.000000e+00> : vector<16x8xf32>
    %69 = tpu.matmul %67, %68, %cst_53 {dimension_numbers = #tpu.dot_dimension_numbers<[1], [0], [0], [1], [0, 0, 1, 1], [], []>} : vector<16x24xf32>, vector<24x8xf32>, vector<16x8xf32> -> vector<16x8xf32>
    %70 = vector.broadcast %5 : vector<1x8xf32> to vector<16x8xf32>
    %71 = arith.addf %69, %70 : vector<16x8xf32>
    %72 = vector.shape_cast %71 : vector<16x8xf32> to vector<1x16x8xf32>
    %cst_54 = arith.constant dense<0.000000e+00> : vector<1x8xf32>
    %73 = vector.multi_reduction <add>, %72, %cst_54 [1] : vector<1x16x8xf32> to vector<1x8xf32>
    %74 = arith.mulf %72, %72 : vector<1x16x8xf32>
    %cst_55 = arith.constant dense<0.000000e+00> : vector<1x8xf32>
    %75 = vector.multi_reduction <add>, %74, %cst_55 [1] : vector<1x16x8xf32> to vector<1x8xf32>
    %cst_56 = arith.constant dense<0.000000e+00> : vector<1x8xf32>
    %76 = tpu.matmul %73, %0, %cst_56 {dimension_numbers = #tpu.dot_dimension_numbers<[1], [0], [0], [1], [0, 0, 1, 1], [], []>} : vector<1x8xf32>, vector<8x8xf32>, vector<1x8xf32> -> vector<1x8xf32>
    %cst_57 = arith.constant 6.250000e-02 : f32
    %77 = vector.broadcast %cst_57 : f32 to vector<1x8xf32>
    %78 = arith.mulf %76, %77 : vector<1x8xf32>
    %cst_58 = arith.constant dense<0.000000e+00> : vector<1x8xf32>
    %79 = tpu.matmul %75, %0, %cst_58 {dimension_numbers = #tpu.dot_dimension_numbers<[1], [0], [0], [1], [0, 0, 1, 1], [], []>} : vector<1x8xf32>, vector<8x8xf32>, vector<1x8xf32> -> vector<1x8xf32>
    %cst_59 = arith.constant 6.250000e-02 : f32
    %80 = vector.broadcast %cst_59 : f32 to vector<1x8xf32>
    %81 = arith.mulf %79, %80 : vector<1x8xf32>
    %82 = arith.mulf %78, %78 : vector<1x8xf32>
    %83 = arith.subf %81, %82 : vector<1x8xf32>
    %cst_60 = arith.constant 0.000000e+00 : f32
    %84 = vector.broadcast %cst_60 : f32 to vector<1x8xf32>
    %85 = arith.maximumf %83, %84 : vector<1x8xf32>
    %cst_61 = arith.constant 9.99999974E-6 : f32
    %86 = vector.broadcast %cst_61 : f32 to vector<1x8xf32>
    %87 = arith.addf %85, %86 : vector<1x8xf32>
    %88 = math.rsqrt %87 : vector<1x8xf32>
    %cst_62 = arith.constant dense<0.000000e+00> : vector<1x8xf32>
    %89 = tpu.matmul %78, %1, %cst_62 {dimension_numbers = #tpu.dot_dimension_numbers<[1], [0], [0], [1], [0, 0, 1, 1], [], []>} : vector<1x8xf32>, vector<8x8xf32>, vector<1x8xf32> -> vector<1x8xf32>
    %cst_63 = arith.constant dense<0.000000e+00> : vector<1x8xf32>
    %90 = tpu.matmul %88, %1, %cst_63 {dimension_numbers = #tpu.dot_dimension_numbers<[1], [0], [0], [1], [0, 0, 1, 1], [], []>} : vector<1x8xf32>, vector<8x8xf32>, vector<1x8xf32> -> vector<1x8xf32>
    %91 = arith.mulf %90, %6 : vector<1x8xf32>
    %92 = arith.mulf %89, %91 : vector<1x8xf32>
    %93 = arith.subf %7, %92 : vector<1x8xf32>
    %94 = vector.shape_cast %91 : vector<1x8xf32> to vector<1x1x8xf32>
    %95 = vector.broadcast %94 : vector<1x1x8xf32> to vector<1x16x8xf32>
    %96 = arith.mulf %72, %95 : vector<1x16x8xf32>
    %97 = vector.shape_cast %93 : vector<1x8xf32> to vector<1x1x8xf32>
    %98 = vector.broadcast %97 : vector<1x1x8xf32> to vector<1x16x8xf32>
    %99 = arith.addf %96, %98 : vector<1x16x8xf32>
    %100 = arith.negf %99 : vector<1x16x8xf32>
    %101 = math.exp %100 : vector<1x16x8xf32>
    %cst_64 = arith.constant 1.000000e+00 : f32
    %102 = vector.broadcast %cst_64 : f32 to vector<1x16x8xf32>
    %103 = arith.addf %102, %101 : vector<1x16x8xf32>
    %104 = arith.divf %102, %103 : vector<1x16x8xf32>
    %105 = arith.mulf %99, %104 : vector<1x16x8xf32>
    %106 = vector.shape_cast %16 : vector<1x16x4xf32> to vector<16x4xf32>
    %c0_65 = arith.constant 0 : index
    %c0_66 = arith.constant 0 : index
    %107 = vector.load %arg8[%c0_65, %c0_66] : memref<4x8xf32, #tpu.memory_space<vmem>>, vector<4x8xf32>
    %cst_67 = arith.constant dense<0.000000e+00> : vector<16x8xf32>
    %108 = tpu.matmul %106, %107, %cst_67 {dimension_numbers = #tpu.dot_dimension_numbers<[1], [0], [0], [1], [0, 0, 1, 1], [], []>} : vector<16x4xf32>, vector<4x8xf32>, vector<16x8xf32> -> vector<16x8xf32>
    %109 = vector.broadcast %8 : vector<1x8xf32> to vector<16x8xf32>
    %110 = arith.addf %108, %109 : vector<16x8xf32>
    %111 = vector.shape_cast %110 : vector<16x8xf32> to vector<1x16x8xf32>
    %112 = arith.addf %105, %111 : vector<1x16x8xf32>
    %c0_68 = arith.constant 0 : index
    %c0_69 = arith.constant 0 : index
    %c0_70 = arith.constant 0 : index
    %113 = vector.load %arg9[%c0_68, %c0_69, %c0_70] : memref<1x16x8xf32, #tpu.memory_space<vmem>>, vector<1x16x8xf32>
    tpu.vector_store %arg9[%c0_68, %c0_69, %c0_70], %112 {strides = array<i32>} : memref<1x16x8xf32, #tpu.memory_space<vmem>>, vector<1x16x8xf32>,
    return
  }
  func.func @transform_0(%arg0: i32) -> (i32, i32, i32) {
    %c0_i32 = arith.constant 0 : i32
    %c0_i32_0 = arith.constant 0 : i32
    %c0_i32_1 = arith.constant 0 : i32
    return %arg0, %c0_i32, %c0_i32_0 : i32, i32, i32
  }
  func.func @transform_1(%arg0: i32) -> (i32, i32, i32) {
    %c0_i32 = arith.constant 0 : i32
    %c0_i32_0 = arith.constant 0 : i32
    %c0_i32_1 = arith.constant 0 : i32
    return %arg0, %c0_i32, %c0_i32_0 : i32, i32, i32
  }
  func.func @transform_2(%arg0: i32) -> (i32, i32) {
    %c0_i32 = arith.constant 0 : i32
    %c0_i32_0 = arith.constant 0 : i32
    %c0_i32_1 = arith.constant 0 : i32
    return %c0_i32, %c0_i32_0 : i32, i32
  }
  func.func @transform_3(%arg0: i32) -> (i32, i32) {
    %c0_i32 = arith.constant 0 : i32
    %c0_i32_0 = arith.constant 0 : i32
    %c0_i32_1 = arith.constant 0 : i32
    return %c0_i32, %c0_i32_0 : i32, i32
  }
  func.func @transform_4(%arg0: i32) -> (i32, i32) {
    %c0_i32 = arith.constant 0 : i32
    %c0_i32_0 = arith.constant 0 : i32
    %c0_i32_1 = arith.constant 0 : i32
    return %c0_i32, %c0_i32_0 : i32, i32
  }
  func.func @transform_5(%arg0: i32) -> (i32, i32) {
    %c0_i32 = arith.constant 0 : i32
    %c0_i32_0 = arith.constant 0 : i32
    %c0_i32_1 = arith.constant 0 : i32
    return %c0_i32, %c0_i32_0 : i32, i32
  }
  func.func @transform_6(%arg0: i32) -> (i32, i32) {
    %c0_i32 = arith.constant 0 : i32
    %c0_i32_0 = arith.constant 0 : i32
    %c0_i32_1 = arith.constant 0 : i32
    return %c0_i32, %c0_i32_0 : i32, i32
  }
  func.func @transform_7(%arg0: i32) -> (i32, i32) {
    %c0_i32 = arith.constant 0 : i32
    %c0_i32_0 = arith.constant 0 : i32
    %c0_i32_1 = arith.constant 0 : i32
    return %c0_i32, %c0_i32_0 : i32, i32
  }
  func.func @transform_8(%arg0: i32) -> (i32, i32, i32) {
    %c0_i32 = arith.constant 0 : i32
    %c0_i32_0 = arith.constant 0 : i32
    %c0_i32_1 = arith.constant 0 : i32
    return %arg0, %c0_i32, %c0_i32_0 : i32, i32, i32
  }
}

</mosaic_0001>

<bundles_post_ra>
// kernel: tpu_custom_call.1
= control target key start
LH: loop header
LB: loop body
LE: loop exit
PB: predicated region body
PF: predicated region fallthrough
CT: control target
= control target key end

     0   :  { %s1051_s27 = smov 0   ;;  %s1182_s0 = inlined_call_operand.vmem [shape: f32[2,16,4], index: 0, kind: input, shape index: {}]   ;;  %s1183_s1 = inlined_call_operand.vmem [shape: f32[2,1,16], index: 1, kind: input, shape index: {}]   ;;  %s1184_s2 = inlined_call_operand.vmem [shape: f32[12,8], index: 2, kind: input, shape index: {}]   ;;  %s1185_s3 = inlined_call_operand.vmem [shape: f32[24,8], index: 3, kind: input, shape index: {}]   ;;  %s1186_s4 = inlined_call_operand.vmem [shape: f32[8,8], index: 4, kind: input, shape index: {}]   ;;  %s1187_s5 = inlined_call_operand.vmem [shape: f32[8,8], index: 5, kind: input, shape index: {}]   ;;  %s1188_s6 = inlined_call_operand.vmem [shape: f32[8,8], index: 6, kind: input, shape index: {}]   ;;  %s1189_s7 = inlined_call_operand.vmem [shape: f32[4,8], index: 7, kind: input, shape index: {}]   ;;  %s1190_s8 = inlined_call_operand.vmem [shape: f32[2,16,8], index: 8, kind: output, shape index: {}]  }
   0x1 LB: > { %s923_s28 = sadd.s32 4294967295, %s999_s27   ;;  %p927_p0 = scmp.ge.s32.totalorder %s999_s27, 1  ;;  %s999_s27 = sphi %s1051_s27, %s18_s27  }
   0x2   : > { %p270_p1 = scmp.lt.s32.totalorder %s999_s27, 3 }
   0x4   : > { %p271_p2 = pnand %p927_p0, %p270_p1 }
   0x5   : > { %p307_p3 = scmp.lt.s32.totalorder (!%p271_p2), %s923_s28, 1  ;;  %s1002_s11 = smov (!%p271_p2), 4  }
   0x6   : > { %274 = sbr.rel (%p271_p2) target bundleno = 1235 (0x4d3), region = 52  ;;  %s1003_s12 = smov (!%p271_p2), 8  }
   0x7   : > { %s1004_s26 = smov (!%p271_p2), 120   ;;  %s1005_s13 = smov (!%p271_p2), 16  }
   0xb   : > { %vm330_vm0 = vcmask 57344   ;;  %v1001_v0 = vmov 0.0   ;;  %s1192_s28 = smov (!%p307_p3, %s923_s28), 1  ;;  %vm335_vm1 = vcmask 31744   ;;  %v364_v5 = vld [vmem:[%s1184_s2 + $0x8] sm:$0xf] }
   0xc   : > { %331 = vst.msk [vmem:[#allocation2 + $0x7] sm:$0x1] %vm330_vm0, %v1001_v0  ;;  %s954_s29 = sshll.u32 %s1192_s28, 4  ;;  %vm373_vm2 = vcmask 1043456   ;;  %v363_v6 = vld [vmem:[%s1184_s2] sm:$0xff]  ;;  %vm360_vm3 = vcmask 64512   ;;  %s314_s25 = scalar_lea.vmem %s1183_s1, %s1192_s28 }
   0xd   : > { %332 = vst.msk [vmem:[#allocation2 + $0x18] sm:$0x1] %vm330_vm0, %v1001_v0  ;;  %s311_s10 = scalar_lea.vmem %s1182_s0, %s954_s29  ;;  %932 = vmatpush.msk.msra.mxu0 %vm373_vm2, %v364_v5  ;;  %vm366_vm4 = vcmask 97280   ;;  %v320_v17 = vld [vmem:[%s1187_s5] sm:$0xff]  ;;  %vm616_vm0 = vcmask 195584  }
   0xe   : > { %v1067_v1 = vld [vmem:[%s311_s10] sm:$0xff]  ;;  %v1069_v2 = vld [vmem:[%s311_s10 + $0x8] sm:$0xff]  ;;  %446 = vmatpush.msra.mxu2 %v320_v17 }
   0xf   : > { %344 = vrot.lane.b32.xlu0 %v1067_v1, %s1002_s11  ;;  %336 = vst.msk [vmem:[#allocation2 + $0x8] sm:$0xff] %vm335_vm1, %v1067_v1  ;;  %346 = vrot.lane.b32.xlu1 %v1069_v2, %s1002_s11  ;;  %v969_v19 = vld [vmem:[%s1186_s4] ss:$0 sm:$0xff]  ;;  %v323_v61 = vld [vmem:[%s1186_s4 + $0x1] sm:$0x1] }
  0x10   : > { %337 = vst.msk [vmem:[#allocation2 + $0x10] sm:$0xff] %vm335_vm1, %v1069_v2  ;;  %392 = vmatpush.msra.mxu0 %v363_v6  ;;  %470 = vmatpush.msrb.mxu2 %v320_v17  ;;  %v321_v43 = vld [vmem:[%s1188_s6] sm:$0xff] }
  0x11   : > { %508 = vmatpush.msra.mxu3 %v321_v43  ;;  %531 = vmatpush.msra.mxu1 %v321_v43  ;;  %v970_v46 = vld [vmem:[%s314_s25] ss:$0 sm:$0xff]  ;;  %v324_v62 = vld [vmem:[%s1186_s4 + $0x2] sm:$0x1] }
  0x12   : > { %769 = vmatpush.msrb.mxu0 %v321_v43  ;;  %404 = vrot.lane.b32.xlu2 %v970_v46, %s1004_s26  ;;  %v329_v60 = vld [vmem:[%s314_s25] sm:$0x1]  ;;  %v614_v46 = vld [vmem:[%s1185_s3 + $0x10] sm:$0xff] }
  0x13   : > { %684 = vmatpush.msrb.mxu3 %v320_v17  ;;  %708 = vmatpush.msrb.mxu1 %v320_v17  ;;  %v400_v63 = vmul.f32 %v329_v60, %v323_v61  ;;  %v401_v0 = vmul.f32 %v329_v60, %v324_v62  ;;  %v971_v60 = vld [vmem:[%s1186_s4 + $0x3] ss:$0 sm:$0xff] }
  0x16   : > { %v338_v9 = vld [vmem:[#allocation2 + $0x7] sm:$0xff] }
  0x17   : > { %v340_v3 = vld [vmem:[#allocation2 + $0x9] sm:$0xff]  ;;  %v341_v4 = vld [vmem:[#allocation2 + $0x11] sm:$0xff] }
  0x18   : > { %352 = vrot.lane.b32.xlu0 %v340_v3, %s1003_s12  ;;  %354 = vrot.lane.b32.xlu1 %v341_v4, %s1003_s12  ;;  %v339_v13 = vld [vmem:[#allocation2 + $0xf] sm:$0xff] }
  0x6c   : > { %v405_v3 = vpop.permute.xlu2 %404 }
  0x6d   : > { %v407_v6 = vadd.f32 %v405_v3, %v401_v0 }
  0x81   : > { %v345_v7 = vpop.permute.xlu0 %344  ;;  %v347_v8 = vpop.permute.xlu1 %346 }
  0x82   : > { %v358_v10 = vsel %vm335_vm1, %v338_v9, %v345_v7  ;;  %v359_v14 = vsel %vm335_vm1, %v339_v13, %v347_v8 }
  0x8a   : > { %v353_v11 = vpop.permute.xlu0 %352  ;;  %v355_v15 = vpop.permute.xlu1 %354 }
  0x8b   : > { %v361_v12 = vsel %vm360_vm3, %v358_v10, %v353_v11  ;;  %v362_v16 = vsel %vm360_vm3, %v359_v14, %v355_v15 }
  0x8c   : > { %933 = vmatmul.msk.f32.vlgmr.msra.gmra.mxu0 %vm366_vm4, %v361_v12 }
  0x94   : > { %934 = vmatmul.msk.f32.gmra.mxu0 %vm366_vm4, %v362_v16  ;;  %vm609_vm4 = vcmask 130048  }
 0x109   : > { %v394_v18 = vpop.f32.mrf.mxu0 }
 0x10a   : > { %v1096_v20 = vadd.f32 %v969_v19, %v394_v18 }
 0x10c   : > { %v417_v22 = vmul.f32 %v1096_v20, %v1096_v20  ;;  %v408_v24 = vsel %vm360_vm3, %v1096_v20, 0.0 }
 0x10e   : > { %v419_v28 = vsel %vm360_vm3, %v417_v22, 0.0 }
 0x111   : > { %v397_v21 = vpop.f32.mrf.mxu0 }
 0x112   : > { %v1100_v23 = vadd.f32 %v969_v19, %v397_v21 }
 0x114   : > { %v409_v25 = vsel %vm360_vm3, %v1100_v23, 0.0  ;;  %v418_v26 = vmul.f32 %v1100_v23, %v1100_v23 }
 0x115   : > { %v410_v27 = vadd.f32 %v409_v25, %v408_v24 }
 0x116   : > { %v420_v29 = vsel %vm360_vm3, %v418_v26, 0.0 }
 0x117   : > { %v411_v30 = vrot.slane %v410_v27, 4  ;;  %v421_v31 = vadd.f32 %v420_v29, %v419_v28 }
 0x119   : > { %v422_v32 = vrot.slane %v421_v31, 4  ;;  %v412_v33 = vadd.f32 %v411_v30, %v410_v27 }
 0x11b   : > { %v423_v34 = vadd.f32 %v422_v32, %v421_v31  ;;  %v413_v35 = vrot.slane %v412_v33, 2 }
 0x11d   : > { %v414_v36 = vadd.f32 %v413_v35, %v412_v33  ;;  %v424_v37 = vrot.slane %v423_v34, 2 }
 0x11f   : > { %v415_v38 = vrot.slane %v414_v36, 1  ;;  %v425_v40 = vadd.f32 %v424_v37, %v423_v34 }
 0x121   : > { %v416_v39 = vadd.f32 %v415_v38, %v414_v36  ;;  %v426_v41 = vrot.slane %v425_v40, 1 }
 0x123   : > { %935 = vmatmul.msk.f32.vlgmr.msra.gmra.mxu2 %vm360_vm3, %v416_v39  ;;  %v427_v42 = vadd.f32 %v426_v41, %v425_v40 }
 0x124   : > { %636 = vmatpush.msra.mxu2 %v614_v46 }
 0x12b   : > { %936 = vmatmul.msk.f32.vlgmr.msrb.gmra.mxu2 %vm360_vm3, %v427_v42 }
 0x1a6   : > { %v448_v44 = vpop.f32.mrf.mxu2 }
 0x1a7   : > { %v451_v45 = vmul.f32 0.0625, %v448_v44 }
 0x1a9   : > { %937 = vmatmul.msk.f32.vlgmr.msra.gmra.mxu3 %vm360_vm3, %v451_v45  ;;  %v476_v48 = vmul.f32 %v451_v45, %v451_v45 }
 0x1aa   : > { %746 = vmatpush.msra.mxu3 %v321_v43 }
 0x1ae   : > { %v472_v47 = vpop.f32.mrf.mxu2 }
 0x1af   : > { %v475_v49 = vmul.f32 0.0625, %v472_v47  ;;  %v613_v47 = vld [vmem:[%s1185_s3 + $0x8] sm:$0xff] }
 0x1b0   : > { %637 = vmatpush.msra.mxu2 %v613_v47 }
 0x1b1   : > { %v477_v50 = vsub.f32 %v475_v49, %v476_v48  ;;  %v612_v48 = vld [vmem:[%s1185_s3] sm:$0xff] }
 0x1b2   : > { %638 = vmatpush.msra.mxu2 %v612_v48 }
 0x1b3   : > { %v478_v51 = vmax.f32 %v477_v50, 0.0 }
 0x1b5   : > { %v479_v52 = vadd.f32 1e-05, %v478_v51 }
 0x1b7   : > { %973 = vrsqrt.f32 %v479_v52  ;;  %vm486_vm6 = vweird.f32 %v479_v52 }
 0x1bd   : > { %v974_v53 = vpop.eup %973 }
 0x1be   : > { %v481_v54 = vmul.f32 %v974_v53, %v479_v52  ;;  %vm487_vm5 = vweird.f32 %v974_v53 }
 0x1bf   : > { %vm488_vm7 = vmor %vm486_vm6, %vm487_vm5 }
 0x1c0   : > { %v482_v55 = vmul.f32 %v974_v53, %v481_v54 }
 0x1c2   : > { %v483_v56 = vmul.f32 0.5, %v482_v55 }
 0x1c4   : > { %v484_v57 = vsub.f32 1.5, %v483_v56 }
 0x1c6   : > { %v485_v58 = vmul.f32 %v974_v53, %v484_v57 }
 0x1c8   : > { %v489_v59 = vsel %vm488_vm7, %v974_v53, %v485_v58 }
 0x1c9   : > { %938 = vmatmul.msk.f32.vlgmr.msra.gmra.mxu1 %vm360_vm3, %v489_v59 }
 0x22c   : > { %v510_v7 = vpop.f32.mrf.mxu3 }
 0x246   : > { %v533_v4 = vpop.f32.mrf.mxu1 }
 0x247   : > { %v536_v5 = vmul.f32 %v533_v4, %v400_v63 }
 0x249   : > { %v537_v8 = vmul.f32 %v536_v5, %v510_v7  ;;  %v539_v9 = vperm.slane %v536_v5, 0 }
 0x24b   : > { %v538_v10 = vsub.f32 %v407_v6, %v537_v8  ;;  %v540_v11 = vmul.f32 %v539_v9, %v1096_v20  ;;  %v541_v12 = vmul.f32 %v539_v9, %v1100_v23 }
 0x24d   : > { %v542_v13 = vperm.slane %v538_v10, 0 }
 0x24f   : > { %v543_v14 = vadd.f32 %v542_v13, %v540_v11  ;;  %v544_v15 = vadd.f32 %v542_v13, %v541_v12 }
 0x251   : > { %v939_v16 = vmul.f32 -1.442695, %v543_v14  ;;  %v940_v17 = vmul.f32 -1.442695, %v544_v15 }
 0x253   : > { %975 = vpow2.f32 %v939_v16 }
 0x254   : > { %977 = vpow2.f32 %v940_v17 }
 0x259   : > { %v976_v18 = vpop.eup %975 }
 0x25a   : > { %v978_v19 = vpop.eup %977  ;;  %v551_v21 = vadd.f32 1.0, %v976_v18 }
 0x25b   : > { %v552_v22 = vadd.f32 1.0, %v978_v19 }
 0x25c   : > { %979 = vrcp.f32 %v551_v21  ;;  %v564_v23 = vand.u32 2147483648, %v551_v21  ;;  %v562_v31 = vand.u32 2147483647, %v551_v21  ;;  %vm558_vm10 = vweird.f32 %v551_v21 }
 0x25d   : > { %981 = vrcp.f32 %v552_v22  ;;  %v579_v29 = vand.u32 2147483648, %v552_v22  ;;  %v577_v33 = vand.u32 2147483647, %v552_v22  ;;  %vm573_vm11 = vweird.f32 %v552_v22 }
 0x25e   : > { %v565_v36 = vor.u32 1.1754944e-38, %v564_v23  ;;  %vm563_vm14 = vcmp.eq.f32.partialorder %v562_v31, 8.507059e+37 }
 0x25f   : > { %v580_v37 = vor.u32 1.1754944e-38, %v579_v29  ;;  %vm578_vm15 = vcmp.eq.f32.partialorder %v577_v33, 8.507059e+37 }
 0x262   : > { %v980_v24 = vpop.eup %979 }
 0x263   : > { %v982_v25 = vpop.eup %981  ;;  %v554_v26 = vmul.f32 %v980_v24, %v551_v21  ;;  %vm559_vm8 = vweird.f32 %v980_v24 }
 0x264   : > { %v569_v27 = vmul.f32 %v982_v25, %v552_v22  ;;  %vm574_vm9 = vweird.f32 %v982_v25  ;;  %vm560_vm12 = vmor %vm558_vm10, %vm559_vm8 }
 0x265   : > { %v555_v20 = vsub.f32 1.0, %v554_v26  ;;  %vm575_vm13 = vmor %vm573_vm11, %vm574_vm9 }
 0x266   : > { %v570_v28 = vsub.f32 1.0, %v569_v27 }
 0x267   : > { %v556_v30 = vmul.f32 %v980_v24, %v555_v20 }
 0x268   : > { %v571_v32 = vmul.f32 %v982_v25, %v570_v28 }
 0x269   : > { %v557_v34 = vadd.f32 %v980_v24, %v556_v30 }
 0x26a   : > { %v572_v35 = vadd.f32 %v982_v25, %v571_v32 }
 0x26b   : > { %v561_v38 = vsel %vm560_vm12, %v980_v24, %v557_v34  ;;  %v823_v24 = vld [vmem:[%s1189_s7] sm:$0xf] }
 0x26c   : > { %v576_v39 = vsel %vm575_vm13, %v982_v25, %v572_v35  ;;  %v566_v40 = vsel %vm563_vm14, %v565_v36, %v561_v38  ;;  %949 = vmatpush.msk.msra.mxu1 %vm373_vm2, %v823_v24 }
 0x26d   : > { %v581_v41 = vsel %vm578_vm15, %v580_v37, %v576_v39  ;;  %v583_v42 = vmul.f32 %v566_v40, %v543_v14  ;;  %v326_v37 = vld [vmem:[%s1186_s4 + $0x4] sm:$0x1]  ;;  %v327_v40 = vld [vmem:[%s1186_s4 + $0x5] sm:$0x1] }
 0x26e   : > { %v584_v43 = vmul.f32 %v581_v41, %v544_v15 }
 0x26f   : > { %593 = vrot.lane.b32.xlu2 %v583_v42, %s1003_s12  ;;  %585 = vst.msk [vmem:[#allocation2 + $0x8] sm:$0xff] %vm360_vm3, %v583_v42 }
 0x270   : > { %595 = vrot.lane.b32.xlu1 %v584_v43, %s1003_s12  ;;  %586 = vst.msk [vmem:[#allocation2 + $0x10] sm:$0xff] %vm360_vm3, %v584_v43 }
 0x276   : > { %v587_v50 = vld [vmem:[#allocation2 + $0x7] sm:$0xff] }
 0x277   : > { %v590_v44 = vld [vmem:[#allocation2 + $0x11] sm:$0xff]  ;;  %v589_v45 = vld [vmem:[#allocation2 + $0x9] sm:$0xff] }
 0x278   : > { %603 = vrot.lane.b32.xlu2 %v590_v44, %s1005_s13  ;;  %601 = vrot.lane.b32.xlu0 %v589_v45, %s1005_s13  ;;  %v588_v55 = vld [vmem:[#allocation2 + $0xf] sm:$0xff]  ;;  %s319_s13 = scalar_lea.vmem %s1190_s8, %s954_s29 }
 0x2c9   : > { %v594_v49 = vpop.permute.xlu2 %593 }
 0x2ca   : > { %v607_v51 = vsel %vm360_vm3, %v587_v50, %v594_v49 }
 0x2d2   : > { %v604_v57 = vpop.permute.xlu2 %603 }
 0x2e2   : > { %v596_v54 = vpop.permute.xlu1 %595 }
 0x2e3   : > { %v608_v56 = vsel %vm360_vm3, %v588_v55, %v596_v54 }
 0x2e4   : > { %v611_v58 = vsel %vm609_vm4, %v608_v56, %v604_v57 }
 0x2ea   : > { %v602_v52 = vpop.permute.xlu0 %601 }
 0x2eb   : > { %v610_v53 = vsel %vm609_vm4, %v607_v51, %v602_v52 }
 0x2ec   : > { %941 = vmatmul.msk.f32.vlgmr.msra.gmra.mxu2 %vm616_vm0, %v610_v53 }
 0x2f4   : > { %942 = vmatmul.msk.f32.gmra.mxu2 %vm616_vm0, %v611_v58 }
 0x36f   : > { %v640_v59 = vpop.f32.mrf.mxu2 }
 0x370   : > { %v641_v61 = vadd.f32 %v971_v60, %v640_v59 }
 0x372   : > { %v655_v63 = vmul.f32 %v641_v61, %v641_v61  ;;  %v646_v3 = vsel %vm360_vm3, %v641_v61, 0.0 }
 0x374   : > { %v657_v7 = vsel %vm360_vm3, %v655_v63, 0.0 }
 0x377   : > { %v643_v62 = vpop.f32.mrf.mxu2 }
 0x378   : > { %v644_v0 = vadd.f32 %v971_v60, %v643_v62 }
 0x37a   : > { %v647_v4 = vsel %vm360_vm3, %v644_v0, 0.0  ;;  %v656_v5 = vmul.f32 %v644_v0, %v644_v0 }
 0x37b   : > { %v648_v6 = vadd.f32 %v647_v4, %v646_v3 }
 0x37c   : > { %v658_v8 = vsel %vm360_vm3, %v656_v5, 0.0 }
 0x37d   : > { %v649_v9 = vrot.slane %v648_v6, 4  ;;  %v659_v10 = vadd.f32 %v658_v8, %v657_v7  ;;  %v972_v7 = vld [vmem:[%s1186_s4 + $0x6] ss:$0 sm:$0xff] }
 0x37f   : > { %v650_v11 = vadd.f32 %v649_v9, %v648_v6  ;;  %v660_v12 = vrot.slane %v659_v10, 4 }
 0x381   : > { %v651_v13 = vrot.slane %v650_v11, 2  ;;  %v661_v14 = vadd.f32 %v660_v12, %v659_v10 }
 0x383   : > { %v652_v15 = vadd.f32 %v651_v13, %v650_v11  ;;  %v662_v16 = vrot.slane %v661_v14, 2 }
 0x385   : > { %v653_v17 = vrot.slane %v652_v15, 1  ;;  %v663_v18 = vadd.f32 %v662_v16, %v661_v14 }
 0x387   : > { %v654_v19 = vadd.f32 %v653_v17, %v652_v15  ;;  %v664_v21 = vrot.slane %v663_v18, 1 }
 0x389   : > { %943 = vmatmul.msk.f32.vlgmr.msrb.gmra.mxu3 %vm360_vm3, %v654_v19  ;;  %v665_v22 = vadd.f32 %v664_v21, %v663_v18 }
 0x38b   : > { %944 = vmatmul.msk.f32.vlgmr.msrb.gmra.mxu1 %vm360_vm3, %v665_v22 }
 0x393   : > { %950 = vmatmul.msk.f32.vlgmr.msra.gmra.mxu1 %vm335_vm1, %v1067_v1 }
 0x39b   : > { %951 = vmatmul.msk.f32.gmra.mxu1 %vm335_vm1, %v1069_v2 }
 0x408   : > { %v710_v25 = vpop.f32.mrf.mxu1 }
 0x409   : > { %v713_v20 = vmul.f32 0.0625, %v710_v25 }
 0x40c   : > { %v686_v26 = vpop.f32.mrf.mxu3 }
 0x40d   : > { %v689_v27 = vmul.f32 0.0625, %v686_v26 }
 0x40f   : > { %v714_v28 = vmul.f32 %v689_v27, %v689_v27  ;;  %945 = vmatmul.msk.f32.vlgmr.msra.gmra.mxu3 %vm360_vm3, %v689_v27 }
 0x410   : > { %v849_v55 = vpop.f32.mrf.mxu1 }
 0x411   : > { %v715_v23 = vsub.f32 %v713_v20, %v714_v28  ;;  %v850_v17 = vadd.f32 %v972_v7, %v849_v55 }
 0x413   : > { %v716_v29 = vmax.f32 %v715_v23, 0.0 }
 0x415   : > { %v717_v30 = vadd.f32 1e-05, %v716_v29 }
 0x417   : > { %983 = vrsqrt.f32 %v717_v30  ;;  %vm724_vm5 = vweird.f32 %v717_v30 }
 0x418   : > { %v852_v8 = vpop.f32.mrf.mxu1 }
 0x419   : > { %v853_v15 = vadd.f32 %v972_v7, %v852_v8 }
 0x41d   : > { %v984_v31 = vpop.eup %983 }
 0x41e   : > { %v719_v32 = vmul.f32 %v984_v31, %v717_v30  ;;  %vm725_vm2 = vweird.f32 %v984_v31 }
 0x41f   : > { %vm726_vm6 = vmor %vm724_vm5, %vm725_vm2 }
 0x420   : > { %v720_v33 = vmul.f32 %v984_v31, %v719_v32 }
 0x422   : > { %v721_v34 = vmul.f32 0.5, %v720_v33 }
 0x424   : > { %v722_v35 = vsub.f32 1.5, %v721_v34 }
 0x426   : > { %v723_v1 = vmul.f32 %v984_v31, %v722_v35 }
 0x428   : > { %v727_v36 = vsel %vm726_vm6, %v984_v31, %v723_v1 }
 0x429   : > { %946 = vmatmul.msk.f32.vlgmr.msrb.gmra.mxu0 %vm360_vm3, %v727_v36 }
 0x492   : > { %v748_v39 = vpop.f32.mrf.mxu3 }
 0x4a6   : > { %v771_v38 = vpop.f32.mrf.mxu0 }
 0x4a7   : > { %v774_v2 = vmul.f32 %v771_v38, %v326_v37 }
 0x4a9   : > { %v775_v41 = vmul.f32 %v774_v2, %v748_v39  ;;  %v777_v42 = vperm.slane %v774_v2, 0 }
 0x4ab   : > { %v776_v43 = vsub.f32 %v327_v40, %v775_v41  ;;  %v778_v44 = vmul.f32 %v777_v42, %v641_v61  ;;  %v779_v45 = vmul.f32 %v777_v42, %v644_v0 }
 0x4ad   : > { %v780_v46 = vperm.slane %v776_v43, 0 }
 0x4af   : > { %v781_v47 = vadd.f32 %v780_v46, %v778_v44  ;;  %v782_v48 = vadd.f32 %v780_v46, %v779_v45 }
 0x4b1   : > { %v947_v49 = vmul.f32 -1.442695, %v781_v47  ;;  %v948_v50 = vmul.f32 -1.442695, %v782_v48 }
 0x4b3   : > { %985 = vpow2.f32 %v947_v49 }
 0x4b4   : > { %987 = vpow2.f32 %v948_v50 }
 0x4b9   : > { %v986_v51 = vpop.eup %985 }
 0x4ba   : > { %v988_v52 = vpop.eup %987  ;;  %v789_v53 = vadd.f32 1.0, %v986_v51 }
 0x4bb   : > { %v790_v54 = vadd.f32 1.0, %v988_v52 }
 0x4bc   : > { %989 = vrcp.f32 %v789_v53  ;;  %v802_v61 = vand.u32 2147483648, %v789_v53  ;;  %v800_v0 = vand.u32 2147483647, %v789_v53  ;;  %vm796_vm8 = vweird.f32 %v789_v53 }
 0x4bd   : > { %991 = vrcp.f32 %v790_v54  ;;  %v817_v3 = vand.u32 2147483648, %v790_v54  ;;  %v815_v5 = vand.u32 2147483647, %v790_v54  ;;  %vm811_vm10 = vweird.f32 %v790_v54 }
 0x4be   : > { %v803_v9 = vor.u32 1.1754944e-38, %v802_v61  ;;  %vm801_vm11 = vcmp.eq.f32.partialorder %v800_v0, 8.507059e+37 }
 0x4bf   : > { %v818_v12 = vor.u32 1.1754944e-38, %v817_v3  ;;  %vm816_vm13 = vcmp.eq.f32.partialorder %v815_v5, 8.507059e+37 }
 0x4c2   : > { %v990_v56 = vpop.eup %989 }
 0x4c3   : > { %v992_v57 = vpop.eup %991  ;;  %v792_v58 = vmul.f32 %v990_v56, %v789_v53  ;;  %vm797_vm1 = vweird.f32 %v990_v56 }
 0x4c4   : > { %v807_v59 = vmul.f32 %v992_v57, %v790_v54  ;;  %vm812_vm7 = vweird.f32 %v992_v57  ;;  %vm798_vm9 = vmor %vm796_vm8, %vm797_vm1 }
 0x4c5   : > { %v793_v60 = vsub.f32 1.0, %v792_v58  ;;  %vm813_vm12 = vmor %vm811_vm10, %vm812_vm7 }
 0x4c6   : > { %v808_v62 = vsub.f32 1.0, %v807_v59 }
 0x4c7   : > { %v794_v63 = vmul.f32 %v990_v56, %v793_v60 }
 0x4c8   : > { %v809_v4 = vmul.f32 %v992_v57, %v808_v62 }
 0x4c9   : > { %v795_v6 = vadd.f32 %v990_v56, %v794_v63 }
 0x4ca   : > { %v810_v10 = vadd.f32 %v992_v57, %v809_v4 }
 0x4cb   : > { %v799_v11 = vsel %vm798_vm9, %v990_v56, %v795_v6 }
 0x4cc   : > { %v804_v13 = vsel %vm801_vm11, %v803_v9, %v799_v11  ;;  %v814_v14 = vsel %vm813_vm12, %v992_v57, %v810_v10 }
 0x4cd   : > { %v821_v16 = vmul.f32 %v804_v13, %v781_v47  ;;  %v819_v18 = vsel %vm816_vm13, %v818_v12, %v814_v14 }
 0x4ce   : > { %v822_v19 = vmul.f32 %v819_v18, %v782_v48 }
 0x4cf   : > { %v855_v21 = vadd.f32 %v850_v17, %v821_v16 }
 0x4d0   : > { %v856_v22 = vadd.f32 %v853_v15, %v822_v19 }
 0x4d1   : > { %857 = vst.msk [vmem:[%s319_s13] sm:$0xff] %vm360_vm3, %v855_v21 }
 0x4d2   : > { %858 = vst.msk [vmem:[%s319_s13 + $0x8] sm:$0xff] %vm360_vm3, %v856_v22 }
 0x4d3 PF: > { %s18_s27 = sadd.s32 1, %s999_s27  }
 0x4d4   : > { %p15_p4 = scmp.ge.s32.totalorder %s18_s27, 4  }
 0x4d6   :  { %17 = sbr.rel (!%p15_p4) target bundleno = 1 (0x1), region = 85 }

// kernel: tpu_custom_call.1
= control target key start
LH: loop header
LB: loop body
LE: loop exit
PB: predicated region body
PF: predicated region fallthrough
CT: control target
= control target key end

     0   :  { %s1051_s27 = smov 0   ;;  %s1182_s0 = inlined_call_operand.vmem [shape: f32[2,16,4], index: 0, kind: input, shape index: {}]   ;;  %s1183_s1 = inlined_call_operand.vmem [shape: f32[2,1,16], index: 1, kind: input, shape index: {}]   ;;  %s1184_s2 = inlined_call_operand.vmem [shape: f32[12,8], index: 2, kind: input, shape index: {}]   ;;  %s1185_s3 = inlined_call_operand.vmem [shape: f32[24,8], index: 3, kind: input, shape index: {}]   ;;  %s1186_s4 = inlined_call_operand.vmem [shape: f32[8,8], index: 4, kind: input, shape index: {}]   ;;  %s1187_s5 = inlined_call_operand.vmem [shape: f32[8,8], index: 5, kind: input, shape index: {}]   ;;  %s1188_s6 = inlined_call_operand.vmem [shape: f32[8,8], index: 6, kind: input, shape index: {}]   ;;  %s1189_s7 = inlined_call_operand.vmem [shape: f32[4,8], index: 7, kind: input, shape index: {}]   ;;  %s1190_s8 = inlined_call_operand.vmem [shape: f32[2,16,8], index: 8, kind: output, shape index: {}]  }
   0x1 LB: > { %s923_s28 = sadd.s32 4294967295, %s999_s27   ;;  %p927_p0 = scmp.ge.s32.totalorder %s999_s27, 1  ;;  %s999_s27 = sphi %s1051_s27, %s18_s27  }
   0x2   : > { %p270_p1 = scmp.lt.s32.totalorder %s999_s27, 3 }
   0x4   : > { %p271_p2 = pnand %p927_p0, %p270_p1 }
   0x5   : > { %p307_p3 = scmp.lt.s32.totalorder (!%p271_p2), %s923_s28, 1  ;;  %s1002_s11 = smov (!%p271_p2), 4  }
   0x6   : > { %274 = sbr.rel (%p271_p2) target bundleno = 1235 (0x4d3), region = 52  ;;  %s1003_s12 = smov (!%p271_p2), 8  }
   0x7   : > { %s1004_s26 = smov (!%p271_p2), 120   ;;  %s1005_s13 = smov (!%p271_p2), 16  }
   0xb   : > { %vm330_vm0 = vcmask 57344   ;;  %v1001_v0 = vmov 0.0   ;;  %s1192_s28 = smov (!%p307_p3, %s923_s28), 1  ;;  %vm335_vm1 = vcmask 31744   ;;  %v364_v5 = vld [vmem:[%s1184_s2 + $0x8] sm:$0xf] }
   0xc   : > { %331 = vst.msk [vmem:[#allocation2 + $0x7] sm:$0x1] %vm330_vm0, %v1001_v0  ;;  %s954_s29 = sshll.u32 %s1192_s28, 4  ;;  %vm373_vm2 = vcmask 1043456   ;;  %v363_v6 = vld [vmem:[%s1184_s2] sm:$0xff]  ;;  %vm360_vm3 = vcmask 64512   ;;  %s314_s25 = scalar_lea.vmem %s1183_s1, %s1192_s28 }
   0xd   : > { %332 = vst.msk [vmem:[#allocation2 + $0x18] sm:$0x1] %vm330_vm0, %v1001_v0  ;;  %s311_s10 = scalar_lea.vmem %s1182_s0, %s954_s29  ;;  %932 = vmatpush.msk.msra.mxu0 %vm373_vm2, %v364_v5  ;;  %vm366_vm4 = vcmask 97280   ;;  %v320_v17 = vld [vmem:[%s1187_s5] sm:$0xff]  ;;  %vm616_vm0 = vcmask 195584  }
   0xe   : > { %v1067_v1 = vld [vmem:[%s311_s10] sm:$0xff]  ;;  %v1069_v2 = vld [vmem:[%s311_s10 + $0x8] sm:$0xff]  ;;  %446 = vmatpush.msra.mxu2 %v320_v17 }
   0xf   : > { %344 = vrot.lane.b32.xlu0 %v1067_v1, %s1002_s11  ;;  %336 = vst.msk [vmem:[#allocation2 + $0x8] sm:$0xff] %vm335_vm1, %v1067_v1  ;;  %346 = vrot.lane.b32.xlu1 %v1069_v2, %s1002_s11  ;;  %v969_v19 = vld [vmem:[%s1186_s4] ss:$0 sm:$0xff]  ;;  %v323_v61 = vld [vmem:[%s1186_s4 + $0x1] sm:$0x1] }
  0x10   : > { %337 = vst.msk [vmem:[#allocation2 + $0x10] sm:$0xff] %vm335_vm1, %v1069_v2  ;;  %392 = vmatpush.msra.mxu0 %v363_v6  ;;  %470 = vmatpush.msrb.mxu2 %v320_v17  ;;  %v321_v43 = vld [vmem:[%s1188_s6] sm:$0xff] }
  0x11   : > { %508 = vmatpush.msra.mxu3 %v321_v43  ;;  %531 = vmatpush.msra.mxu1 %v321_v43  ;;  %v970_v46 = vld [vmem:[%s314_s25] ss:$0 sm:$0xff]  ;;  %v324_v62 = vld [vmem:[%s1186_s4 + $0x2] sm:$0x1] }
  0x12   : > { %769 = vmatpush.msrb.mxu0 %v321_v43  ;;  %404 = vrot.lane.b32.xlu2 %v970_v46, %s1004_s26  ;;  %v329_v60 = vld [vmem:[%s314_s25] sm:$0x1]  ;;  %v614_v46 = vld [vmem:[%s1185_s3 + $0x10] sm:$0xff] }
  0x13   : > { %684 = vmatpush.msrb.mxu3 %v320_v17  ;;  %708 = vmatpush.msrb.mxu1 %v320_v17  ;;  %v400_v63 = vmul.f32 %v329_v60, %v323_v61  ;;  %v401_v0 = vmul.f32 %v329_v60, %v324_v62  ;;  %v971_v60 = vld [vmem:[%s1186_s4 + $0x3] ss:$0 sm:$0xff] }
  0x16   : > { %v338_v9 = vld [vmem:[#allocation2 + $0x7] sm:$0xff] }
  0x17   : > { %v340_v3 = vld [vmem:[#allocation2 + $0x9] sm:$0xff]  ;;  %v341_v4 = vld [vmem:[#allocation2 + $0x11] sm:$0xff] }
  0x18   : > { %352 = vrot.lane.b32.xlu0 %v340_v3, %s1003_s12  ;;  %354 = vrot.lane.b32.xlu1 %v341_v4, %s1003_s12  ;;  %v339_v13 = vld [vmem:[#allocation2 + $0xf] sm:$0xff] }
  0x6c   : > { %v405_v3 = vpop.permute.xlu2 %404 }
  0x6d   : > { %v407_v6 = vadd.f32 %v405_v3, %v401_v0 }
  0x81   : > { %v345_v7 = vpop.permute.xlu0 %344  ;;  %v347_v8 = vpop.permute.xlu1 %346 }
  0x82   : > { %v358_v10 = vsel %vm335_vm1, %v338_v9, %v345_v7  ;;  %v359_v14 = vsel %vm335_vm1, %v339_v13, %v347_v8 }
  0x8a   : > { %v353_v11 = vpop.permute.xlu0 %352  ;;  %v355_v15 = vpop.permute.xlu1 %354 }
  0x8b   : > { %v361_v12 = vsel %vm360_vm3, %v358_v10, %v353_v11  ;;  %v362_v16 = vsel %vm360_vm3, %v359_v14, %v355_v15 }
  0x8c   : > { %933 = vmatmul.msk.f32.vlgmr.msra.gmra.mxu0 %vm366_vm4, %v361_v12 }
  0x94   : > { %934 = vmatmul.msk.f32.gmra.mxu0 %vm366_vm4, %v362_v16  ;;  %vm609_vm4 = vcmask 130048  }
 0x109   : > { %v394_v18 = vpop.f32.mrf.mxu0 }
 0x10a   : > { %v1096_v20 = vadd.f32 %v969_v19, %v394_v18 }
 0x10c   : > { %v417_v22 = vmul.f32 %v1096_v20, %v1096_v20  ;;  %v408_v24 = vsel %vm360_vm3, %v1096_v20, 0.0 }
 0x10e   : > { %v419_v28 = vsel %vm360_vm3, %v417_v22, 0.0 }
 0x111   : > { %v397_v21 = vpop.f32.mrf.mxu0 }
 0x112   : > { %v1100_v23 = vadd.f32 %v969_v19, %v397_v21 }
 0x114   : > { %v409_v25 = vsel %vm360_vm3, %v1100_v23, 0.0  ;;  %v418_v26 = vmul.f32 %v1100_v23, %v1100_v23 }
 0x115   : > { %v410_v27 = vadd.f32 %v409_v25, %v408_v24 }
 0x116   : > { %v420_v29 = vsel %vm360_vm3, %v418_v26, 0.0 }
 0x117   : > { %v411_v30 = vrot.slane %v410_v27, 4  ;;  %v421_v31 = vadd.f32 %v420_v29, %v419_v28 }
 0x119   : > { %v422_v32 = vrot.slane %v421_v31, 4  ;;  %v412_v33 = vadd.f32 %v411_v30, %v410_v27 }
 0x11b   : > { %v423_v34 = vadd.f32 %v422_v32, %v421_v31  ;;  %v413_v35 = vrot.slane %v412_v33, 2 }
 0x11d   : > { %v414_v36 = vadd.f32 %v413_v35, %v412_v33  ;;  %v424_v37 = vrot.slane %v423_v34, 2 }
 0x11f   : > { %v415_v38 = vrot.slane %v414_v36, 1  ;;  %v425_v40 = vadd.f32 %v424_v37, %v423_v34 }
 0x121   : > { %v416_v39 = vadd.f32 %v415_v38, %v414_v36  ;;  %v426_v41 = vrot.slane %v425_v40, 1 }
 0x123   : > { %935 = vmatmul.msk.f32.vlgmr.msra.gmra.mxu2 %vm360_vm3, %v416_v39  ;;  %v427_v42 = vadd.f32 %v426_v41, %v425_v40 }
 0x124   : > { %636 = vmatpush.msra.mxu2 %v614_v46 }
 0x12b   : > { %936 = vmatmul.msk.f32.vlgmr.msrb.gmra.mxu2 %vm360_vm3, %v427_v42 }
 0x1a6   : > { %v448_v44 = vpop.f32.mrf.mxu2 }
 0x1a7   : > { %v451_v45 = vmul.f32 0.0625, %v448_v44 }
 0x1a9   : > { %937 = vmatmul.msk.f32.vlgmr.msra.gmra.mxu3 %vm360_vm3, %v451_v45  ;;  %v476_v48 = vmul.f32 %v451_v45, %v451_v45 }
 0x1aa   : > { %746 = vmatpush.msra.mxu3 %v321_v43 }
 0x1ae   : > { %v472_v47 = vpop.f32.mrf.mxu2 }
 0x1af   : > { %v475_v49 = vmul.f32 0.0625, %v472_v47  ;;  %v613_v47 = vld [vmem:[%s1185_s3 + $0x8] sm:$0xff] }
 0x1b0   : > { %637 = vmatpush.msra.mxu2 %v613_v47 }
 0x1b1   : > { %v477_v50 = vsub.f32 %v475_v49, %v476_v48  ;;  %v612_v48 = vld [vmem:[%s1185_s3] sm:$0xff] }
 0x1b2   : > { %638 = vmatpush.msra.mxu2 %v612_v48 }
 0x1b3   : > { %v478_v51 = vmax.f32 %v477_v50, 0.0 }
 0x1b5   : > { %v479_v52 = vadd.f32 1e-05, %v478_v51 }
 0x1b7   : > { %973 = vrsqrt.f32 %v479_v52  ;;  %vm486_vm6 = vweird.f32 %v479_v52 }
 0x1bd   : > { %v974_v53 = vpop.eup %973 }
 0x1be   : > { %v481_v54 = vmul.f32 %v974_v53, %v479_v52  ;;  %vm487_vm5 = vweird.f32 %v974_v53 }
 0x1bf   : > { %vm488_vm7 = vmor %vm486_vm6, %vm487_vm5 }
 0x1c0   : > { %v482_v55 = vmul.f32 %v974_v53, %v481_v54 }
 0x1c2   : > { %v483_v56 = vmul.f32 0.5, %v482_v55 }
 0x1c4   : > { %v484_v57 = vsub.f32 1.5, %v483_v56 }
 0x1c6   : > { %v485_v58 = vmul.f32 %v974_v53, %v484_v57 }
 0x1c8   : > { %v489_v59 = vsel %vm488_vm7, %v974_v53, %v485_v58 }
 0x1c9   : > { %938 = vmatmul.msk.f32.vlgmr.msra.gmra.mxu1 %vm360_vm3, %v489_v59 }
 0x22c   : > { %v510_v7 = vpop.f32.mrf.mxu3 }
 0x246   : > { %v533_v4 = vpop.f32.mrf.mxu1 }
 0x247   : > { %v536_v5 = vmul.f32 %v533_v4, %v400_v63 }
 0x249   : > { %v537_v8 = vmul.f32 %v536_v5, %v510_v7  ;;  %v539_v9 = vperm.slane %v536_v5, 0 }
 0x24b   : > { %v538_v10 = vsub.f32 %v407_v6, %v537_v8  ;;  %v540_v11 = vmul.f32 %v539_v9, %v1096_v20  ;;  %v541_v12 = vmul.f32 %v539_v9, %v1100_v23 }
 0x24d   : > { %v542_v13 = vperm.slane %v538_v10, 0 }
 0x24f   : > { %v543_v14 = vadd.f32 %v542_v13, %v540_v11  ;;  %v544_v15 = vadd.f32 %v542_v13, %v541_v12 }
 0x251   : > { %v939_v16 = vmul.f32 -1.442695, %v543_v14  ;;  %v940_v17 = vmul.f32 -1.442695, %v544_v15 }
 0x253   : > { %975 = vpow2.f32 %v939_v16 }
 0x254   : > { %977 = vpow2.f32 %v940_v17 }
 0x259   : > { %v976_v18 = vpop.eup %975 }
 0x25a   : > { %v978_v19 = vpop.eup %977  ;;  %v551_v21 = vadd.f32 1.0, %v976_v18 }
 0x25b   : > { %v552_v22 = vadd.f32 1.0, %v978_v19 }
 0x25c   : > { %979 = vrcp.f32 %v551_v21  ;;  %v564_v23 = vand.u32 2147483648, %v551_v21  ;;  %v562_v31 = vand.u32 2147483647, %v551_v21  ;;  %vm558_vm10 = vweird.f32 %v551_v21 }
 0x25d   : > { %981 = vrcp.f32 %v552_v22  ;;  %v579_v29 = vand.u32 2147483648, %v552_v22  ;;  %v577_v33 = vand.u32 2147483647, %v552_v22  ;;  %vm573_vm11 = vweird.f32 %v552_v22 }
 0x25e   : > { %v565_v36 = vor.u32 1.1754944e-38, %v564_v23  ;;  %vm563_vm14 = vcmp.eq.f32.partialorder %v562_v31, 8.507059e+37 }
 0x25f   : > { %v580_v37 = vor.u32 1.1754944e-38, %v579_v29  ;;  %vm578_vm15 = vcmp.eq.f32.partialorder %v577_v33, 8.507059e+37 }
 0x262   : > { %v980_v24 = vpop.eup %979 }
 0x263   : > { %v982_v25 = vpop.eup %981  ;;  %v554_v26 = vmul.f32 %v980_v24, %v551_v21  ;;  %vm559_vm8 = vweird.f32 %v980_v24 }
 0x264   : > { %v569_v27 = vmul.f32 %v982_v25, %v552_v22  ;;  %vm574_vm9 = vweird.f32 %v982_v25  ;;  %vm560_vm12 = vmor %vm558_vm10, %vm559_vm8 }
 0x265   : > { %v555_v20 = vsub.f32 1.0, %v554_v26  ;;  %vm575_vm13 = vmor %vm573_vm11, %vm574_vm9 }
 0x266   : > { %v570_v28 = vsub.f32 1.0, %v569_v27 }
 0x267   : > { %v556_v30 = vmul.f32 %v980_v24, %v555_v20 }
 0x268   : > { %v571_v32 = vmul.f32 %v982_v25, %v570_v28 }
 0x269   : > { %v557_v34 = vadd.f32 %v980_v24, %v556_v30 }
 0x26a   : > { %v572_v35 = vadd.f32 %v982_v25, %v571_v32 }
 0x26b   : > { %v561_v38 = vsel %vm560_vm12, %v980_v24, %v557_v34  ;;  %v823_v24 = vld [vmem:[%s1189_s7] sm:$0xf] }
 0x26c   : > { %v576_v39 = vsel %vm575_vm13, %v982_v25, %v572_v35  ;;  %v566_v40 = vsel %vm563_vm14, %v565_v36, %v561_v38  ;;  %949 = vmatpush.msk.msra.mxu1 %vm373_vm2, %v823_v24 }
 0x26d   : > { %v581_v41 = vsel %vm578_vm15, %v580_v37, %v576_v39  ;;  %v583_v42 = vmul.f32 %v566_v40, %v543_v14  ;;  %v326_v37 = vld [vmem:[%s1186_s4 + $0x4] sm:$0x1]  ;;  %v327_v40 = vld [vmem:[%s1186_s4 + $0x5] sm:$0x1] }
 0x26e   : > { %v584_v43 = vmul.f32 %v581_v41, %v544_v15 }
 0x26f   : > { %593 = vrot.lane.b32.xlu2 %v583_v42, %s1003_s12  ;;  %585 = vst.msk [vmem:[#allocation2 + $0x8] sm:$0xff] %vm360_vm3, %v583_v42 }
 0x270   : > { %595 = vrot.lane.b32.xlu1 %v584_v43, %s1003_s12  ;;  %586 = vst.msk [vmem:[#allocation2 + $0x10] sm:$0xff] %vm360_vm3, %v584_v43 }
 0x276   : > { %v587_v50 = vld [vmem:[#allocation2 + $0x7] sm:$0xff] }
 0x277   : > { %v590_v44 = vld [vmem:[#allocation2 + $0x11] sm:$0xff]  ;;  %v589_v45 = vld [vmem:[#allocation2 + $0x9] sm:$0xff] }
 0x278   : > { %603 = vrot.lane.b32.xlu2 %v590_v44, %s1005_s13  ;;  %601 = vrot.lane.b32.xlu0 %v589_v45, %s1005_s13  ;;  %v588_v55 = vld [vmem:[#allocation2 + $0xf] sm:$0xff]  ;;  %s319_s13 = scalar_lea.vmem %s1190_s8, %s954_s29 }
 0x2c9   : > { %v594_v49 = vpop.permute.xlu2 %593 }
 0x2ca   : > { %v607_v51 = vsel %vm360_vm3, %v587_v50, %v594_v49 }
 0x2d2   : > { %v604_v57 = vpop.permute.xlu2 %603 }
 0x2e2   : > { %v596_v54 = vpop.permute.xlu1 %595 }
 0x2e3   : > { %v608_v56 = vsel %vm360_vm3, %v588_v55, %v596_v54 }
 0x2e4   : > { %v611_v58 = vsel %vm609_vm4, %v608_v56, %v604_v57 }
 0x2ea   : > { %v602_v52 = vpop.permute.xlu0 %601 }
 0x2eb   : > { %v610_v53 = vsel %vm609_vm4, %v607_v51, %v602_v52 }
 0x2ec   : > { %941 = vmatmul.msk.f32.vlgmr.msra.gmra.mxu2 %vm616_vm0, %v610_v53 }
 0x2f4   : > { %942 = vmatmul.msk.f32.gmra.mxu2 %vm616_vm0, %v611_v58 }
 0x36f   : > { %v640_v59 = vpop.f32.mrf.mxu2 }
 0x370   : > { %v641_v61 = vadd.f32 %v971_v60, %v640_v59 }
 0x372   : > { %v655_v63 = vmul.f32 %v641_v61, %v641_v61  ;;  %v646_v3 = vsel %vm360_vm3, %v641_v61, 0.0 }
 0x374   : > { %v657_v7 = vsel %vm360_vm3, %v655_v63, 0.0 }
 0x377   : > { %v643_v62 = vpop.f32.mrf.mxu2 }
 0x378   : > { %v644_v0 = vadd.f32 %v971_v60, %v643_v62 }
 0x37a   : > { %v647_v4 = vsel %vm360_vm3, %v644_v0, 0.0  ;;  %v656_v5 = vmul.f32 %v644_v0, %v644_v0 }
 0x37b   : > { %v648_v6 = vadd.f32 %v647_v4, %v646_v3 }
 0x37c   : > { %v658_v8 = vsel %vm360_vm3, %v656_v5, 0.0 }
 0x37d   : > { %v649_v9 = vrot.slane %v648_v6, 4  ;;  %v659_v10 = vadd.f32 %v658_v8, %v657_v7  ;;  %v972_v7 = vld [vmem:[%s1186_s4 + $0x6] ss:$0 sm:$0xff] }
 0x37f   : > { %v650_v11 = vadd.f32 %v649_v9, %v648_v6  ;;  %v660_v12 = vrot.slane %v659_v10, 4 }
 0x381   : > { %v651_v13 = vrot.slane %v650_v11, 2  ;;  %v661_v14 = vadd.f32 %v660_v12, %v659_v10 }
 0x383   : > { %v652_v15 = vadd.f32 %v651_v13, %v650_v11  ;;  %v662_v16 = vrot.slane %v661_v14, 2 }
 0x385   : > { %v653_v17 = vrot.slane %v652_v15, 1  ;;  %v663_v18 = vadd.f32 %v662_v16, %v661_v14 }
 0x387   : > { %v654_v19 = vadd.f32 %v653_v17, %v652_v15  ;;  %v664_v21 = vrot.slane %v663_v18, 1 }
 0x389   : > { %943 = vmatmul.msk.f32.vlgmr.msrb.gmra.mxu3 %vm360_vm3, %v654_v19  ;;  %v665_v22 = vadd.f32 %v664_v21, %v663_v18 }
 0x38b   : > { %944 = vmatmul.msk.f32.vlgmr.msrb.gmra.mxu1 %vm360_vm3, %v665_v22 }
 0x393   : > { %950 = vmatmul.msk.f32.vlgmr.msra.gmra.mxu1 %vm335_vm1, %v1067_v1 }
 0x39b   : > { %951 = vmatmul.msk.f32.gmra.mxu1 %vm335_vm1, %v1069_v2 }
 0x408   : > { %v710_v25 = vpop.f32.mrf.mxu1 }
 0x409   : > { %v713_v20 = vmul.f32 0.0625, %v710_v25 }
 0x40c   : > { %v686_v26 = vpop.f32.mrf.mxu3 }
 0x40d   : > { %v689_v27 = vmul.f32 0.0625, %v686_v26 }
 0x40f   : > { %v714_v28 = vmul.f32 %v689_v27, %v689_v27  ;;  %945 = vmatmul.msk.f32.vlgmr.msra.gmra.mxu3 %vm360_vm3, %v689_v27 }
 0x410   : > { %v849_v55 = vpop.f32.mrf.mxu1 }
 0x411   : > { %v715_v23 = vsub.f32 %v713_v20, %v714_v28  ;;  %v850_v17 = vadd.f32 %v972_v7, %v849_v55 }
 0x413   : > { %v716_v29 = vmax.f32 %v715_v23, 0.0 }
 0x415   : > { %v717_v30 = vadd.f32 1e-05, %v716_v29 }
 0x417   : > { %983 = vrsqrt.f32 %v717_v30  ;;  %vm724_vm5 = vweird.f32 %v717_v30 }
 0x418   : > { %v852_v8 = vpop.f32.mrf.mxu1 }
 0x419   : > { %v853_v15 = vadd.f32 %v972_v7, %v852_v8 }
 0x41d   : > { %v984_v31 = vpop.eup %983 }
 0x41e   : > { %v719_v32 = vmul.f32 %v984_v31, %v717_v30  ;;  %vm725_vm2 = vweird.f32 %v984_v31 }
 0x41f   : > { %vm726_vm6 = vmor %vm724_vm5, %vm725_vm2 }
 0x420   : > { %v720_v33 = vmul.f32 %v984_v31, %v719_v32 }
 0x422   : > { %v721_v34 = vmul.f32 0.5, %v720_v33 }
 0x424   : > { %v722_v35 = vsub.f32 1.5, %v721_v34 }
 0x426   : > { %v723_v1 = vmul.f32 %v984_v31, %v722_v35 }
 0x428   : > { %v727_v36 = vsel %vm726_vm6, %v984_v31, %v723_v1 }
 0x429   : > { %946 = vmatmul.msk.f32.vlgmr.msrb.gmra.mxu0 %vm360_vm3, %v727_v36 }
 0x492   : > { %v748_v39 = vpop.f32.mrf.mxu3 }
 0x4a6   : > { %v771_v38 = vpop.f32.mrf.mxu0 }
 0x4a7   : > { %v774_v2 = vmul.f32 %v771_v38, %v326_v37 }
 0x4a9   : > { %v775_v41 = vmul.f32 %v774_v2, %v748_v39  ;;  %v777_v42 = vperm.slane %v774_v2, 0 }
 0x4ab   : > { %v776_v43 = vsub.f32 %v327_v40, %v775_v41  ;;  %v778_v44 = vmul.f32 %v777_v42, %v641_v61  ;;  %v779_v45 = vmul.f32 %v777_v42, %v644_v0 }
 0x4ad   : > { %v780_v46 = vperm.slane %v776_v43, 0 }
 0x4af   : > { %v781_v47 = vadd.f32 %v780_v46, %v778_v44  ;;  %v782_v48 = vadd.f32 %v780_v46, %v779_v45 }
 0x4b1   : > { %v947_v49 = vmul.f32 -1.442695, %v781_v47  ;;  %v948_v50 = vmul.f32 -1.442695, %v782_v48 }
 0x4b3   : > { %985 = vpow2.f32 %v947_v49 }
 0x4b4   : > { %987 = vpow2.f32 %v948_v50 }
 0x4b9   : > { %v986_v51 = vpop.eup %985 }
 0x4ba   : > { %v988_v52 = vpop.eup %987  ;;  %v789_v53 = vadd.f32 1.0, %v986_v51 }
 0x4bb   : > { %v790_v54 = vadd.f32 1.0, %v988_v52 }
 0x4bc   : > { %989 = vrcp.f32 %v789_v53  ;;  %v802_v61 = vand.u32 2147483648, %v789_v53  ;;  %v800_v0 = vand.u32 2147483647, %v789_v53  ;;  %vm796_vm8 = vweird.f32 %v789_v53 }
 0x4bd   : > { %991 = vrcp.f32 %v790_v54  ;;  %v817_v3 = vand.u32 2147483648, %v790_v54  ;;  %v815_v5 = vand.u32 2147483647, %v790_v54  ;;  %vm811_vm10 = vweird.f32 %v790_v54 }
 0x4be   : > { %v803_v9 = vor.u32 1.1754944e-38, %v802_v61  ;;  %vm801_vm11 = vcmp.eq.f32.partialorder %v800_v0, 8.507059e+37 }
 0x4bf   : > { %v818_v12 = vor.u32 1.1754944e-38, %v817_v3  ;;  %vm816_vm13 = vcmp.eq.f32.partialorder %v815_v5, 8.507059e+37 }
 0x4c2   : > { %v990_v56 = vpop.eup %989 }
 0x4c3   : > { %v992_v57 = vpop.eup %991  ;;  %v792_v58 = vmul.f32 %v990_v56, %v789_v53  ;;  %vm797_vm1 = vweird.f32 %v990_v56 }
 0x4c4   : > { %v807_v59 = vmul.f32 %v992_v57, %v790_v54  ;;  %vm812_vm7 = vweird.f32 %v992_v57  ;;  %vm798_vm9 = vmor %vm796_vm8, %vm797_vm1 }
 0x4c5   : > { %v793_v60 = vsub.f32 1.0, %v792_v58  ;;  %vm813_vm12 = vmor %vm811_vm10, %vm812_vm7 }
 0x4c6   : > { %v808_v62 = vsub.f32 1.0, %v807_v59 }
 0x4c7   : > { %v794_v63 = vmul.f32 %v990_v56, %v793_v60 }
 0x4c8   : > { %v809_v4 = vmul.f32 %v992_v57, %v808_v62 }
 0x4c9   : > { %v795_v6 = vadd.f32 %v990_v56, %v794_v63 }
 0x4ca   : > { %v810_v10 = vadd.f32 %v992_v57, %v809_v4 }
 0x4cb   : > { %v799_v11 = vsel %vm798_vm9, %v990_v56, %v795_v6 }
 0x4cc   : > { %v804_v13 = vsel %vm801_vm11, %v803_v9, %v799_v11  ;;  %v814_v14 = vsel %vm813_vm12, %v992_v57, %v810_v10 }
 0x4cd   : > { %v821_v16 = vmul.f32 %v804_v13, %v781_v47  ;;  %v819_v18 = vsel %vm816_vm13, %v818_v12, %v814_v14 }
 0x4ce   : > { %v822_v19 = vmul.f32 %v819_v18, %v782_v48 }
 0x4cf   : > { %v855_v21 = vadd.f32 %v850_v17, %v821_v16 }
 0x4d0   : > { %v856_v22 = vadd.f32 %v853_v15, %v822_v19 }
 0x4d1   : > { %857 = vst.msk [vmem:[%s319_s13] sm:$0xff] %vm360_vm3, %v855_v21 }
 0x4d2   : > { %858 = vst.msk [vmem:[%s319_s13 + $0x8] sm:$0xff] %vm360_vm3, %v856_v22 }
 0x4d3 PF: > { %s18_s27 = sadd.s32 1, %s999_s27  }
 0x4d4   : > { %p15_p4 = scmp.ge.s32.totalorder %s18_s27, 4  }
 0x4d6   :  { %17 = sbr.rel (!%p15_p4) target bundleno = 1 (0x1), region = 85 }

</bundles_post_ra>
